<compile_context>
chip_gen: v7x
topology: tpu7x:2x2x1
jax: 0.10.0
libtpu: 0.0.40
codegen_flags: <defaults>
</compile_context>

<pallas_src>
import functools

import jax
import jax.numpy as jnp
from jax.experimental import pallas as pl
from jax.experimental.pallas import tpu as pltpu


# ----------------------------------------------------------------------------
# Pallas kernels
# ----------------------------------------------------------------------------
def _stage_kernel(*refs, H, W, dil, apply_relu, skip_mode):
    """One fused XceptionBlock stage for a single batch element (NHWC).

    refs layout (depending on skip_mode):
      x_ref   : (1, H, W, Cin)   unpadded NHWC input tile
      dw_ref  : (9, Cin)         depthwise 3x3 weights, row k = ki*3+kj
      bn1*    : (1, Cin)         folded BN scale/shift (inside DepthwiseSeparableConv2d)
      pw_ref  : (Cin, Cout)      pointwise 1x1 weights
      bn2*    : (1, Cout)        folded BN scale/shift (outer BatchNorm2d)
      [skx_ref: (1, H, W, Cskip) block input x for the residual/skip path]
      [skw/sks/skb : projection-skip 1x1 weights + folded BN]
      o_ref   : (1, H, W, Cout)
      xpad_ref: (H+2*dil, W+2*dil, Cin) VMEM scratch (zero-padded halo)
    """
    if skip_mode == "proj":
        (x_ref, dw_ref, bn1s_ref, bn1b_ref, pw_ref, bn2s_ref, bn2b_ref,
         skx_ref, skw_ref, sks_ref, skb_ref, o_ref, xpad_ref) = refs
    elif skip_mode == "identity":
        (x_ref, dw_ref, bn1s_ref, bn1b_ref, pw_ref, bn2s_ref, bn2b_ref,
         skx_ref, o_ref, xpad_ref) = refs
    else:
        (x_ref, dw_ref, bn1s_ref, bn1b_ref, pw_ref, bn2s_ref, bn2b_ref,
         o_ref, xpad_ref) = refs

    pad = dil
    cin = x_ref.shape[-1]
    cout = pw_ref.shape[-1]

    x = x_ref[0].astype(jnp.float32)                      # (H, W, Cin)
    if apply_relu:
        x = jnp.maximum(x, 0.0)

    # Zero-padded halo built in VMEM scratch (replaces wrapper-side jnp.pad,
    # which cost a full extra HBM read+write of the activation).
    xpad_ref[...] = jnp.zeros_like(xpad_ref)
    xpad_ref[pad:pad + H, pad:pad + W, :] = x

    # 3x3 dilated depthwise conv as 9 plane-wide shifted MACs on the VPU;
    # accumulator is seeded with tap 0 (no zeros + add).
    acc = xpad_ref[0:H, 0:W, :] * dw_ref[0:1, :]
    for k in range(1, 9):
        ki, kj = divmod(k, 3)
        tap = xpad_ref[ki * dil:ki * dil + H, kj * dil:kj * dil + W, :]
        acc = acc + tap * dw_ref[k:k + 1, :]

    # BN over Cin, then ONE (H*W, Cin) x (Cin, Cout) pointwise matmul (MXU).
    acc = acc * bn1s_ref[...] + bn1b_ref[...]
    y = jnp.dot(acc.reshape(H * W, cin), pw_ref[...],
                preferred_element_type=jnp.float32)
    y = y * bn2s_ref[...] + bn2b_ref[...]                 # BN over Cout
    y = y.reshape(H, W, cout)

    # Fused residual / skip path (kept in f32 until the final cast).
    if skip_mode == "identity":
        y = y + skx_ref[0].astype(jnp.float32)
    elif skip_mode == "proj":
        sx = skx_ref[0].astype(jnp.float32)               # (H, W, Cin0)
        sk = jnp.dot(sx.reshape(H * W, sx.shape[-1]), skw_ref[...],
                     preferred_element_type=jnp.float32)
        sk = sk * sks_ref[...] + skb_ref[...]
        y = y + sk.reshape(H, W, cout)

    # Single lane-dense full-block store.
    o_ref[0] = y.astype(o_ref.dtype)


def _skip_add_kernel(x_ref, blk_ref, w_ref, s_ref, b_ref, o_ref, *, H, W):
    """out = block_out + BN(conv1x1(x)).  Only used on the stride>1 fallback
    path; fully vectorized (one matmul, one full-block store, f32 add)."""
    x = x_ref[0].astype(jnp.float32)                      # (H, W, Cin)
    cin = x.shape[-1]
    cout = w_ref.shape[-1]
    sk = jnp.dot(x.reshape(H * W, cin), w_ref[...],
                 preferred_element_type=jnp.float32)
    sk = sk * s_ref[...] + b_ref[...]
    y = blk_ref[0].astype(jnp.float32) + sk.reshape(H, W, cout)
    o_ref[0] = y.astype(o_ref.dtype)


# ----------------------------------------------------------------------------
# pallas_call wrappers
# ----------------------------------------------------------------------------
def dsc_bn_stage(x_nhwc, p, *, dilation, apply_relu,
                 skip_mode=None, skip_inputs=None):
    """ReLU -> depthwise 3x3 -> BN -> pointwise 1x1 -> BN [-> + skip],
    batched over N (grid=(N,), all grid steps independent/parallel)."""
    N, H, W, Cin = x_nhwc.shape
    Cout = p["pw_w"].shape[1]
    pad = dilation                    # kernel_size=3 -> torch padding == dilation
    Hp, Wp = H + 2 * pad, W + 2 * pad

    kern = functools.partial(_stage_kernel, H=H, W=W, dil=dilation,
                             apply_relu=apply_relu, skip_mode=skip_mode)

    in_specs = [
        pl.BlockSpec((1, H, W, Cin), lambda b: (b, 0, 0, 0)),
        pl.BlockSpec((9, Cin), lambda b: (0, 0)),
        pl.BlockSpec((1, Cin), lambda b: (0, 0)),
        pl.BlockSpec((1, Cin), lambda b: (0, 0)),
        pl.BlockSpec((Cin, Cout), lambda b: (0, 0)),
        pl.BlockSpec((1, Cout), lambda b: (0, 0)),
        pl.BlockSpec((1, Cout), lambda b: (0, 0)),
    ]
    args = [x_nhwc, p["dw_w"], p["bn1_scale"], p["bn1_shift"],
            p["pw_w"], p["bn2_scale"], p["bn2_shift"]]

    if skip_mode == "identity":
        skx = skip_inputs["x"]
        cs = skx.shape[-1]
        in_specs.append(pl.BlockSpec((1, H, W, cs), lambda b: (b, 0, 0, 0)))
        args.append(skx)
    elif skip_mode == "proj":
        skx = skip_inputs["x"]
        cs = skx.shape[-1]
        in_specs += [
            pl.BlockSpec((1, H, W, cs), lambda b: (b, 0, 0, 0)),
            pl.BlockSpec((cs, Cout), lambda b: (0, 0)),
            pl.BlockSpec((1, Cout), lambda b: (0, 0)),
            pl.BlockSpec((1, Cout), lambda b: (0, 0)),
        ]
        args += [skx, skip_inputs["w"],
                 skip_inputs["bn_scale"], skip_inputs["bn_shift"]]

    return pl.pallas_call(
        kern,
        out_shape=jax.ShapeDtypeStruct((N, H, W, Cout), x_nhwc.dtype),
        grid=(N,),
        in_specs=in_specs,
        out_specs=pl.BlockSpec((1, H, W, Cout), lambda b: (b, 0, 0, 0)),
        scratch_shapes=[pltpu.VMEM((Hp, Wp, Cin), jnp.float32)],
        compiler_params=pltpu.CompilerParams(dimension_semantics=("parallel",)),
    )(*args)


def _skip_add_call(x_nhwc, block_out, skip_p):
    """Stride>1 fallback: block_out + BN(conv1x1(x)) as its own kernel."""
    N, Ho, Wo, Cin = x_nhwc.shape
    Cout = block_out.shape[-1]
    kern = functools.partial(_skip_add_kernel, H=Ho, W=Wo)
    return pl.pallas_call(
        kern,
        out_shape=jax.ShapeDtypeStruct((N, Ho, Wo, Cout), block_out.dtype),
        grid=(N,),
        in_specs=[
            pl.BlockSpec((1, Ho, Wo, Cin), lambda b: (b, 0, 0, 0)),
            pl.BlockSpec((1, Ho, Wo, Cout), lambda b: (b, 0, 0, 0)),
            pl.BlockSpec((Cin, Cout), lambda b: (0, 0)),
            pl.BlockSpec((1, Cout), lambda b: (0, 0)),
            pl.BlockSpec((1, Cout), lambda b: (0, 0)),
        ],
        out_specs=pl.BlockSpec((1, Ho, Wo, Cout), lambda b: (b, 0, 0, 0)),
        compiler_params=pltpu.CompilerParams(dimension_semantics=("parallel",)),
    )(x_nhwc, block_out, skip_p["w"], skip_p["bn_scale"], skip_p["bn_shift"])


# ----------------------------------------------------------------------------
# Full XceptionBlock forward (Pallas)
# ----------------------------------------------------------------------------
def _stage_channels(in_ch, out_ch, exit_flow):
    if exit_flow:
        return [(in_ch, in_ch), (in_ch, out_ch), (out_ch, out_ch)]
    return [(in_ch, out_ch), (out_ch, out_ch), (out_ch, out_ch)]


def xception_block_forward_nhwc(x, params, *, in_ch, out_ch, stride=1,
                                dilation=1, exit_flow=False, use_1st_relu=True):
    """NHWC-in / NHWC-out forward.  Use this when chaining blocks."""
    has_proj = (in_ch != out_ch) or (stride != 1)
    out = x
    # Stages 1 & 2 (always stride 1).
    for i in range(2):
        apply_relu = use_1st_relu if i == 0 else True
        out = dsc_bn_stage(out, params["stages"][i], dilation=dilation,
                           apply_relu=apply_relu)
    # Stage 3: residual / skip fused into the same kernel when stride == 1.
    if stride == 1:
        if has_proj:
            out = dsc_bn_stage(out, params["stages"][2], dilation=dilation,
                               apply_relu=True, skip_mode="proj",
                               skip_inputs={"x": x, **params["skip"]})
        else:
            out = dsc_bn_stage(out, params["stages"][2], dilation=dilation,
                               apply_relu=True, skip_mode="identity",
                               skip_inputs={"x": x})
        return out
    # stride > 1 fallback: full-res conv, XLA subsample, separate fused skip-add.
    out = dsc_bn_stage(out, params["stages"][2], dilation=dilation,
                       apply_relu=True)
    out = out[:, ::stride, ::stride, :]
    xs = x[:, ::stride, ::stride, :]
    return _skip_add_call(xs, out, params["skip"])


def xception_block_forward(x_nchw, params, *, in_ch, out_ch, stride=1,
                           dilation=1, exit_flow=False, use_1st_relu=True):
    x = jnp.transpose(x_nchw, (0, 2, 3, 1))              # NCHW -> NHWC
    y = xception_block_forward_nhwc(x, params, in_ch=in_ch, out_ch=out_ch,
                                    stride=stride, dilation=dilation,
                                    exit_flow=exit_flow,
                                    use_1st_relu=use_1st_relu)
    return jnp.transpose(y, (0, 3, 1, 2))                # NHWC -> NCHW


# ----------------------------------------------------------------------------
# Deterministic parameter init (folded eval-mode BN)
# ----------------------------------------------------------------------------
def _bn_fold(key, c, eps=1e-5):
    k1, k2, k3, k4 = jax.random.split(key, 4)
    gamma = 1.0 + 0.1 * jax.random.normal(k1, (c,), jnp.float32)
    beta = 0.1 * jax.random.normal(k2, (c,), jnp.float32)
    mean = 0.1 * jax.random.normal(k3, (c,), jnp.float32)
    var = jnp.abs(jax.random.normal(k4, (c,), jnp.float32)) + 0.5
    scale = gamma / jnp.sqrt(var + eps)
    shift = beta - mean * scale
    return scale.reshape(1, c), shift.reshape(1, c)


def _stage_params(key, cin, cout):
    k1, k2, k3, k4 = jax.random.split(key, 4)
    dw = 0.1 * jax.random.normal(k1, (3, 3, cin), jnp.float32)   # torch (cin,1,3,3)
    pw = 0.1 * jax.random.normal(k2, (cin, cout), jnp.float32)   # torch (cout,cin,1,1).T
    bn1s, bn1b = _bn_fold(k3, cin)     # BN inside DepthwiseSeparableConv2d
    bn2s, bn2b = _bn_fold(k4, cout)    # outer BatchNorm2d
    return dict(dw_w=dw.reshape(9, cin), pw_w=pw,
                bn1_scale=bn1s, bn1_shift=bn1b,
                bn2_scale=bn2s, bn2_shift=bn2b)


def init_params(key, in_ch, out_ch, *, exit_flow=False, stride=1):
    chans = _stage_channels(in_ch, out_ch, exit_flow)
    keys = jax.random.split(key, 4)
    stages = [_stage_params(keys[i], cin, cout)
              for i, (cin, cout) in enumerate(chans)]
    params = {"stages": stages}
    if in_ch != out_ch or stride != 1:
        k1, k2 = jax.random.split(keys[3])
        w = 0.1 * jax.random.normal(k1, (in_ch, out_ch), jnp.float32)
        s, b = _bn_fold(k2, out_ch)
        params["skip"] = {"w": w, "bn_scale": s, "bn_shift": b}
    return params


# ----------------------------------------------------------------------------
# Pure-JAX reference (for correctness checking)
# ----------------------------------------------------------------------------
def _ref_stage(x, p, stride, dilation, apply_relu):
    if apply_relu:
        x = jnp.maximum(x, 0.0)
    cin = x.shape[-1]
    cout = p["pw_w"].shape[1]
    dw = p["dw_w"].reshape(3, 3, cin)[:, :, None, :]   # HWIO, I=1 (depthwise)
    pad = dilation
    y = jax.lax.conv_general_dilated(
        x, dw, window_strides=(stride, stride),
        padding=((pad, pad), (pad, pad)),
        rhs_dilation=(dilation, dilation),
        dimension_numbers=("NHWC", "HWIO", "NHWC"),
        feature_group_count=cin)
    y = y * p["bn1_scale"].reshape(1, 1, 1, cin) + p["bn1_shift"].reshape(1, 1, 1, cin)
    y = jnp.einsum("nhwc,co->nhwo", y, p["pw_w"])
    y = y * p["bn2_scale"].reshape(1, 1, 1, cout) + p["bn2_shift"].reshape(1, 1, 1, cout)
    return y


def xception_block_ref(x_nchw, params, *, in_ch, out_ch, stride=1, dilation=1,
                       exit_flow=False, use_1st_relu=True):
    x = jnp.transpose(x_nchw, (0, 2, 3, 1))
    strides = [1, 1, stride]
    out = x
    for i in range(3):
        apply_relu = use_1st_relu if i == 0 else True
        out = _ref_stage(out, params["stages"][i], strides[i], dilation, apply_relu)
    if in_ch != out_ch or stride != 1:
        xs = x[:, ::stride, ::stride, :]
        p = params["skip"]
        cout = p["w"].shape[1]
        sk = jnp.einsum("nhwc,co->nhwo", xs, p["w"])
        sk = sk * p["bn_scale"].reshape(1, 1, 1, cout) + p["bn_shift"].reshape(1, 1, 1, cout)
        y = out + sk
    else:
        y = out + x
    return jnp.transpose(y, (0, 3, 1, 2))


# ----------------------------------------------------------------------------
if __name__ == "__main__":
    key = jax.random.PRNGKey(0)

    configs = [
        # (N, in_ch, out_ch, H, W, stride, dilation, exit_flow, use_1st_relu)
        (2, 8, 16, 16, 16, 1, 1, False, True),    # projection skip, fused into stage 3
        (2, 16, 16, 16, 16, 1, 2, True, False),   # identity skip, dilated, exit flow
    ]
    for (N, in_ch, out_ch, H, W, stride, dilation,
         exit_flow, use_1st_relu) in configs:
        kx, kp, key = jax.random.split(key, 3)
        x = jax.random.normal(kx, (N, in_ch, H, W), jnp.float32)  # NCHW, like PyTorch
        params = init_params(kp, in_ch, out_ch, exit_flow=exit_flow, stride=stride)

        out = xception_block_forward(x, params, in_ch=in_ch, out_ch=out_ch,
                                     stride=stride, dilation=dilation,
                                     exit_flow=exit_flow,
                                     use_1st_relu=use_1st_relu)
        out = jax.block_until_ready(out)
        assert out.shape == (N, out_ch, H, W), out.shape

        ref = xception_block_ref(x, params, in_ch=in_ch, out_ch=out_ch,
                                 stride=stride, dilation=dilation,
                                 exit_flow=exit_flow,
                                 use_1st_relu=use_1st_relu)
        ref = jax.block_until_ready(ref)
        if not bool(jnp.allclose(out, ref, atol=2e-2, rtol=2e-2)):
            raise SystemExit("Pallas output does not match JAX reference")

    print("KERNEL_OK")
</pallas_src>

<mosaic_0001>
module attributes {stable_mosaic.version = 11 : i64} {
  func.func @_stage_kernel(%arg0: i32, %arg1: memref<1x16x16x8xf32, #tpu.memory_space<vmem>>, %arg2: memref<9x8xf32, #tpu.memory_space<vmem>>, %arg3: memref<1x8xf32, #tpu.memory_space<vmem>>, %arg4: memref<1x8xf32, #tpu.memory_space<vmem>>, %arg5: memref<8x16xf32, #tpu.memory_space<vmem>>, %arg6: memref<1x16xf32, #tpu.memory_space<vmem>>, %arg7: memref<1x16xf32, #tpu.memory_space<vmem>>, %arg8: memref<1x16x16x16xf32, #tpu.memory_space<vmem>>, %arg9: memref<18x18x8xf32, #tpu.memory_space<vmem>>) attributes {dimension_semantics = [#tpu.dimension_semantics<parallel>], iteration_bounds = array<i64: 2>, scalar_prefetch = 0 : i64, scratch_operands = 1 : i64, tpu.core_type = #tpu.core_type<tc>, window_params = [{transform_indices = @transform_0, window_bounds = array<i64: 1, 16, 16, 8>}, {pipeline_mode = #tpu.pipeline_mode<synchronous>, transform_indices = @transform_1, window_bounds = array<i64: 9, 8>}, {pipeline_mode = #tpu.pipeline_mode<synchronous>, transform_indices = @transform_2, window_bounds = array<i64: 1, 8>}, {pipeline_mode = #tpu.pipeline_mode<synchronous>, transform_indices = @transform_3, window_bounds = array<i64: 1, 8>}, {pipeline_mode = #tpu.pipeline_mode<synchronous>, transform_indices = @transform_4, window_bounds = array<i64: 8, 16>}, {pipeline_mode = #tpu.pipeline_mode<synchronous>, transform_indices = @transform_5, window_bounds = array<i64: 1, 16>}, {pipeline_mode = #tpu.pipeline_mode<synchronous>, transform_indices = @transform_6, window_bounds = array<i64: 1, 16>}, {transform_indices = @transform_7, window_bounds = array<i64: 1, 16, 16, 16>}]} {
    %c0 = arith.constant 0 : index
    %c0_0 = arith.constant 0 : index
    %c0_1 = arith.constant 0 : index
    %c0_2 = arith.constant 0 : index
    %0 = vector.load %arg1[%c0, %c0_0, %c0_1, %c0_2] : memref<1x16x16x8xf32, #tpu.memory_space<vmem>>, vector<1x16x16x8xf32>
    %1 = vector.shape_cast %0 : vector<1x16x16x8xf32> to vector<16x16x8xf32>
    %cst = arith.constant 0.000000e+00 : f32
    %2 = vector.broadcast %cst : f32 to vector<16x16x8xf32>
    %3 = arith.maximumf %1, %2 : vector<16x16x8xf32>
    %cst_3 = arith.constant 0.000000e+00 : f32
    %4 = vector.broadcast %cst_3 : f32 to vector<18x18x8xf32>
    %c0_4 = arith.constant 0 : index
    %c0_5 = arith.constant 0 : index
    %c0_6 = arith.constant 0 : index
    %5 = vector.load %arg9[%c0_4, %c0_5, %c0_6] : memref<18x18x8xf32, #tpu.memory_space<vmem>>, vector<18x18x8xf32>
    tpu.vector_store %arg9[%c0_4, %c0_5, %c0_6], %4 {strides = array<i32>} : memref<18x18x8xf32, #tpu.memory_space<vmem>>, vector<18x18x8xf32>,
    %c1 = arith.constant 1 : index
    %c1_7 = arith.constant 1 : index
    %c0_8 = arith.constant 0 : index
    %6 = vector.load %arg9[%c1, %c1_7, %c0_8] : memref<18x18x8xf32, #tpu.memory_space<vmem>>, vector<16x16x8xf32>
    tpu.vector_store %arg9[%c1, %c1_7, %c0_8], %3 {strides = array<i32>} : memref<18x18x8xf32, #tpu.memory_space<vmem>>, vector<16x16x8xf32>,
    %c0_9 = arith.constant 0 : index
    %c0_10 = arith.constant 0 : index
    %c0_11 = arith.constant 0 : index
    %7 = vector.load %arg9[%c0_9, %c0_10, %c0_11] : memref<18x18x8xf32, #tpu.memory_space<vmem>>, vector<16x16x8xf32>
    %c0_12 = arith.constant 0 : index
    %c0_13 = arith.constant 0 : index
    %8 = vector.load %arg2[%c0_12, %c0_13] : memref<9x8xf32, #tpu.memory_space<vmem>>, vector<1x8xf32>
    %9 = vector.shape_cast %8 : vector<1x8xf32> to vector<1x1x8xf32>
    %10 = vector.broadcast %9 : vector<1x1x8xf32> to vector<16x16x8xf32>
    %11 = arith.mulf %7, %10 : vector<16x16x8xf32>
    %c0_14 = arith.constant 0 : index
    %c1_15 = arith.constant 1 : index
    %c0_16 = arith.constant 0 : index
    %12 = vector.load %arg9[%c0_14, %c1_15, %c0_16] : memref<18x18x8xf32, #tpu.memory_space<vmem>>, vector<16x16x8xf32>
    %c1_17 = arith.constant 1 : index
    %c0_18 = arith.constant 0 : index
    %13 = vector.load %arg2[%c1_17, %c0_18] : memref<9x8xf32, #tpu.memory_space<vmem>>, vector<1x8xf32>
    %14 = vector.shape_cast %13 : vector<1x8xf32> to vector<1x1x8xf32>
    %15 = vector.broadcast %14 : vector<1x1x8xf32> to vector<16x16x8xf32>
    %16 = arith.mulf %12, %15 : vector<16x16x8xf32>
    %17 = arith.addf %11, %16 : vector<16x16x8xf32>
    %c0_19 = arith.constant 0 : index
    %c2 = arith.constant 2 : index
    %c0_20 = arith.constant 0 : index
    %18 = vector.load %arg9[%c0_19, %c2, %c0_20] : memref<18x18x8xf32, #tpu.memory_space<vmem>>, vector<16x16x8xf32>
    %c2_21 = arith.constant 2 : index
    %c0_22 = arith.constant 0 : index
    %19 = vector.load %arg2[%c2_21, %c0_22] : memref<9x8xf32, #tpu.memory_space<vmem>>, vector<1x8xf32>
    %20 = vector.shape_cast %19 : vector<1x8xf32> to vector<1x1x8xf32>
    %21 = vector.broadcast %20 : vector<1x1x8xf32> to vector<16x16x8xf32>
    %22 = arith.mulf %18, %21 : vector<16x16x8xf32>
    %23 = arith.addf %17, %22 : vector<16x16x8xf32>
    %c1_23 = arith.constant 1 : index
    %c0_24 = arith.constant 0 : index
    %c0_25 = arith.constant 0 : index
    %24 = vector.load %arg9[%c1_23, %c0_24, %c0_25] : memref<18x18x8xf32, #tpu.memory_space<vmem>>, vector<16x16x8xf32>
    %c3 = arith.constant 3 : index
    %c0_26 = arith.constant 0 : index
    %25 = vector.load %arg2[%c3, %c0_26] : memref<9x8xf32, #tpu.memory_space<vmem>>, vector<1x8xf32>
    %26 = vector.shape_cast %25 : vector<1x8xf32> to vector<1x1x8xf32>
    %27 = vector.broadcast %26 : vector<1x1x8xf32> to vector<16x16x8xf32>
    %28 = arith.mulf %24, %27 : vector<16x16x8xf32>
    %29 = arith.addf %23, %28 : vector<16x16x8xf32>
    %c1_27 = arith.constant 1 : index
    %c1_28 = arith.constant 1 : index
    %c0_29 = arith.constant 0 : index
    %30 = vector.load %arg9[%c1_27, %c1_28, %c0_29] : memref<18x18x8xf32, #tpu.memory_space<vmem>>, vector<16x16x8xf32>
    %c4 = arith.constant 4 : index
    %c0_30 = arith.constant 0 : index
    %31 = vector.load %arg2[%c4, %c0_30] : memref<9x8xf32, #tpu.memory_space<vmem>>, vector<1x8xf32>
    %32 = vector.shape_cast %31 : vector<1x8xf32> to vector<1x1x8xf32>
    %33 = vector.broadcast %32 : vector<1x1x8xf32> to vector<16x16x8xf32>
    %34 = arith.mulf %30, %33 : vector<16x16x8xf32>
    %35 = arith.addf %29, %34 : vector<16x16x8xf32>
    %c1_31 = arith.constant 1 : index
    %c2_32 = arith.constant 2 : index
    %c0_33 = arith.constant 0 : index
    %36 = vector.load %arg9[%c1_31, %c2_32, %c0_33] : memref<18x18x8xf32, #tpu.memory_space<vmem>>, vector<16x16x8xf32>
    %c5 = arith.constant 5 : index
    %c0_34 = arith.constant 0 : index
    %37 = vector.load %arg2[%c5, %c0_34] : memref<9x8xf32, #tpu.memory_space<vmem>>, vector<1x8xf32>
    %38 = vector.shape_cast %37 : vector<1x8xf32> to vector<1x1x8xf32>
    %39 = vector.broadcast %38 : vector<1x1x8xf32> to vector<16x16x8xf32>
    %40 = arith.mulf %36, %39 : vector<16x16x8xf32>
    %41 = arith.addf %35, %40 : vector<16x16x8xf32>
    %c2_35 = arith.constant 2 : index
    %c0_36 = arith.constant 0 : index
    %c0_37 = arith.constant 0 : index
    %42 = vector.load %arg9[%c2_35, %c0_36, %c0_37] : memref<18x18x8xf32, #tpu.memory_space<vmem>>, vector<16x16x8xf32>
    %c6 = arith.constant 6 : index
    %c0_38 = arith.constant 0 : index
    %43 = vector.load %arg2[%c6, %c0_38] : memref<9x8xf32, #tpu.memory_space<vmem>>, vector<1x8xf32>
    %44 = vector.shape_cast %43 : vector<1x8xf32> to vector<1x1x8xf32>
    %45 = vector.broadcast %44 : vector<1x1x8xf32> to vector<16x16x8xf32>
    %46 = arith.mulf %42, %45 : vector<16x16x8xf32>
    %47 = arith.addf %41, %46 : vector<16x16x8xf32>
    %c2_39 = arith.constant 2 : index
    %c1_40 = arith.constant 1 : index
    %c0_41 = arith.constant 0 : index
    %48 = vector.load %arg9[%c2_39, %c1_40, %c0_41] : memref<18x18x8xf32, #tpu.memory_space<vmem>>, vector<16x16x8xf32>
    %c7 = arith.constant 7 : index
    %c0_42 = arith.constant 0 : index
    %49 = vector.load %arg2[%c7, %c0_42] : memref<9x8xf32, #tpu.memory_space<vmem>>, vector<1x8xf32>
    %50 = vector.shape_cast %49 : vector<1x8xf32> to vector<1x1x8xf32>
    %51 = vector.broadcast %50 : vector<1x1x8xf32> to vector<16x16x8xf32>
    %52 = arith.mulf %48, %51 : vector<16x16x8xf32>
    %53 = arith.addf %47, %52 : vector<16x16x8xf32>
    %c2_43 = arith.constant 2 : index
    %c2_44 = arith.constant 2 : index
    %c0_45 = arith.constant 0 : index
    %54 = vector.load %arg9[%c2_43, %c2_44, %c0_45] : memref<18x18x8xf32, #tpu.memory_space<vmem>>, vector<16x16x8xf32>
    %c8 = arith.constant 8 : index
    %c0_46 = arith.constant 0 : index
    %55 = vector.load %arg2[%c8, %c0_46] : memref<9x8xf32, #tpu.memory_space<vmem>>, vector<1x8xf32>
    %56 = vector.shape_cast %55 : vector<1x8xf32> to vector<1x1x8xf32>
    %57 = vector.broadcast %56 : vector<1x1x8xf32> to vector<16x16x8xf32>
    %58 = arith.mulf %54, %57 : vector<16x16x8xf32>
    %59 = arith.addf %53, %58 : vector<16x16x8xf32>
    %c0_47 = arith.constant 0 : index
    %c0_48 = arith.constant 0 : index
    %60 = vector.load %arg3[%c0_47, %c0_48] : memref<1x8xf32, #tpu.memory_space<vmem>>, vector<1x8xf32>
    %61 = vector.shape_cast %60 : vector<1x8xf32> to vector<1x1x8xf32>
    %62 = vector.broadcast %61 : vector<1x1x8xf32> to vector<16x16x8xf32>
    %63 = arith.mulf %59, %62 : vector<16x16x8xf32>
    %c0_49 = arith.constant 0 : index
    %c0_50 = arith.constant 0 : index
    %64 = vector.load %arg4[%c0_49, %c0_50] : memref<1x8xf32, #tpu.memory_space<vmem>>, vector<1x8xf32>
    %65 = vector.shape_cast %64 : vector<1x8xf32> to vector<1x1x8xf32>
    %66 = vector.broadcast %65 : vector<1x1x8xf32> to vector<16x16x8xf32>
    %67 = arith.addf %63, %66 : vector<16x16x8xf32>
    %68 = vector.shape_cast %67 : vector<16x16x8xf32> to vector<256x8xf32>
    %c0_51 = arith.constant 0 : index
    %c0_52 = arith.constant 0 : index
    %69 = vector.load %arg5[%c0_51, %c0_52] : memref<8x16xf32, #tpu.memory_space<vmem>>, vector<8x16xf32>
    %cst_53 = arith.constant dense<0.000000e+00> : vector<256x16xf32>
    %70 = tpu.matmul %68, %69, %cst_53 {dimension_numbers = #tpu.dot_dimension_numbers<[1], [0], [0], [1], [0, 0, 1, 1], [], []>} : vector<256x8xf32>, vector<8x16xf32>, vector<256x16xf32> -> vector<256x16xf32>
    %c0_54 = arith.constant 0 : index
    %c0_55 = arith.constant 0 : index
    %71 = vector.load %arg6[%c0_54, %c0_55] : memref<1x16xf32, #tpu.memory_space<vmem>>, vector<1x16xf32>
    %72 = vector.broadcast %71 : vector<1x16xf32> to vector<256x16xf32>
    %73 = arith.mulf %70, %72 : vector<256x16xf32>
    %c0_56 = arith.constant 0 : index
    %c0_57 = arith.constant 0 : index
    %74 = vector.load %arg7[%c0_56, %c0_57] : memref<1x16xf32, #tpu.memory_space<vmem>>, vector<1x16xf32>
    %75 = vector.broadcast %74 : vector<1x16xf32> to vector<256x16xf32>
    %76 = arith.addf %73, %75 : vector<256x16xf32>
    %77 = vector.shape_cast %76 : vector<256x16xf32> to vector<16x16x16xf32>
    %c0_58 = arith.constant 0 : index
    %c0_59 = arith.constant 0 : index
    %c0_60 = arith.constant 0 : index
    %c0_61 = arith.constant 0 : index
    %78 = vector.load %arg8[%c0_58, %c0_59, %c0_60, %c0_61] : memref<1x16x16x16xf32, #tpu.memory_space<vmem>>, vector<1x16x16x16xf32>
    %79 = vector.shape_cast %78 : vector<1x16x16x16xf32> to vector<16x16x16xf32>
    %80 = vector.shape_cast %77 : vector<16x16x16xf32> to vector<1x16x16x16xf32>
    tpu.vector_store %arg8[%c0_58, %c0_59, %c0_60, %c0_61], %80 {strides = array<i32>} : memref<1x16x16x16xf32, #tpu.memory_space<vmem>>, vector<1x16x16x16xf32>,
    return
  }
  func.func @transform_0(%arg0: i32) -> (i32, i32, i32, i32) {
    %c0_i32 = arith.constant 0 : i32
    %c0_i32_0 = arith.constant 0 : i32
    %c0_i32_1 = arith.constant 0 : i32
    %c0_i32_2 = arith.constant 0 : i32
    return %arg0, %c0_i32, %c0_i32_0, %c0_i32_1 : i32, i32, i32, i32
  }
  func.func @transform_1(%arg0: i32) -> (i32, i32) {
    %c0_i32 = arith.constant 0 : i32
    %c0_i32_0 = arith.constant 0 : i32
    %c0_i32_1 = arith.constant 0 : i32
    return %c0_i32, %c0_i32_0 : i32, i32
  }
  func.func @transform_2(%arg0: i32) -> (i32, i32) {
    %c0_i32 = arith.constant 0 : i32
    %c0_i32_0 = arith.constant 0 : i32
    %c0_i32_1 = arith.constant 0 : i32
    return %c0_i32, %c0_i32_0 : i32, i32
  }
  func.func @transform_3(%arg0: i32) -> (i32, i32) {
    %c0_i32 = arith.constant 0 : i32
    %c0_i32_0 = arith.constant 0 : i32
    %c0_i32_1 = arith.constant 0 : i32
    return %c0_i32, %c0_i32_0 : i32, i32
  }
  func.func @transform_4(%arg0: i32) -> (i32, i32) {
    %c0_i32 = arith.constant 0 : i32
    %c0_i32_0 = arith.constant 0 : i32
    %c0_i32_1 = arith.constant 0 : i32
    return %c0_i32, %c0_i32_0 : i32, i32
  }
  func.func @transform_5(%arg0: i32) -> (i32, i32) {
    %c0_i32 = arith.constant 0 : i32
    %c0_i32_0 = arith.constant 0 : i32
    %c0_i32_1 = arith.constant 0 : i32
    return %c0_i32, %c0_i32_0 : i32, i32
  }
  func.func @transform_6(%arg0: i32) -> (i32, i32) {
    %c0_i32 = arith.constant 0 : i32
    %c0_i32_0 = arith.constant 0 : i32
    %c0_i32_1 = arith.constant 0 : i32
    return %c0_i32, %c0_i32_0 : i32, i32
  }
  func.func @transform_7(%arg0: i32) -> (i32, i32, i32, i32) {
    %c0_i32 = arith.constant 0 : i32
    %c0_i32_0 = arith.constant 0 : i32
    %c0_i32_1 = arith.constant 0 : i32
    %c0_i32_2 = arith.constant 0 : i32
    return %arg0, %c0_i32, %c0_i32_0, %c0_i32_1 : i32, i32, i32, i32
  }
}

</mosaic_0001>

<bundles_post_ra>
// kernel: tpu_custom_call.1
= control target key start
LH: loop header
LB: loop body
LE: loop exit
PB: predicated region body
PF: predicated region fallthrough
CT: control target
= control target key end

     0   :  { %12 = vsyncpa [#allocation4], 0  ;;  %s3511_s0 = inlined_call_operand.vmem [shape: f32[2,16,16,8], index: 0, kind: input, shape index: {}]   ;;  %s3512_s1 = inlined_call_operand.vmem [shape: f32[9,8], index: 1, kind: input, shape index: {}]   ;;  %s3513_s2 = inlined_call_operand.vmem [shape: f32[1,8], index: 2, kind: input, shape index: {}]   ;;  %s3514_s3 = inlined_call_operand.vmem [shape: f32[1,8], index: 3, kind: input, shape index: {}]   ;;  %s3515_s4 = inlined_call_operand.vmem [shape: f32[8,16], index: 4, kind: input, shape index: {}]   ;;  %s3516_s5 = inlined_call_operand.vmem [shape: f32[1,16], index: 5, kind: input, shape index: {}]   ;;  %s3517_s6 = inlined_call_operand.vmem [shape: f32[1,16], index: 6, kind: input, shape index: {}]   ;;  %s3518_s7 = inlined_call_operand.hbm [shape: f32[2,16,16,16], index: 7, kind: output, shape index: {}]  }
   0x1   :  { %14 = vsyncpa [#allocation4 + $0x1], 0  ;;  %s2200_s24 = smov 0   ;;  %s2202_s25 = smov 0  }
   0x2   :  { %s2204_s26 = smov 0   ;;  %s2206_s27 = smov 0  }
   0x3 LB: > { %s2221_s28 = sadd.s32 4294967295, %s2154_s27   ;;  %s1895_s29 = sadd.s32 4294967294, %s2154_s27   ;;  %s2154_s27 = sphi %s2206_s27, %s3524_s27   ;;  %s2150_s26 = sphi %s2204_s26, %s3523_s26   ;;  %s2146_s25 = sphi %s2202_s25, %s3522_s25   ;;  %s2142_s24 = sphi %s2200_s24, %s3521_s24  }
   0x4   : > { %s2225_s30 = sadd.s32 1, %s2154_s27   ;;  %s179_s8 = sadd.s32 1, %s2150_s26 }
   0x5   : > { %s176_s9 = ssub.s32 %s2154_s27, %s2225_s30  ;;  %p189_p0 = scmp.ne.s32.totalorder %s2150_s26, %s2146_s25 }
   0x6   : > { %p177_p1 = scmp.eq.s32.totalorder %s176_s9, 0  ;;  %p190_p2 = scmp.eq.s32.totalorder %s2221_s28, 1 }
   0x7   : > { %p195_p3 = scmp.ne.s32.totalorder %s2146_s25, %s2142_s24  ;;  %p196_p4 = scmp.eq.s32.totalorder %s1895_s29, 1 }
   0x8   : > { %s2236_s10 = scalar_select %p177_p1, %s2150_s26, %s179_s8  }
   0x9   : > { %p2238_p5 = por %p190_p2, %p189_p0  ;;  %p2242_p6 = por %p196_p4, %p195_p3 }
   0xa   : > { %p1898_p7 = scmp.ge.s32.totalorder %s2154_s27, 1  ;;  %p240_p8 = scmp.lt.s32.totalorder %s2154_s27, 3 }
   0xc   : > { %p241_p9 = pnand %p1898_p7, %p240_p8 }
   0xd   : > { %v1386_v0 = vld [vmem:[%s3515_s4] sm:$0xff] (!%p241_p9)  ;;  %p272_p10 = scmp.lt.s32.totalorder (!%p241_p9), %s2221_s28, 1  ;;  %vm341_vm0 = vcmask (!%p241_p9), 64512   ;;  %vm344_vm1 = vcmask (!%p241_p9), 58368   ;;  %v2156_v1 = vmov (!%p241_p9), 0.0   ;;  %s269_s29 = sand.u32 (!%p241_p9), 1, %s2146_s25  }
   0xe   : > { %244 = sbr.rel (%p241_p9) target bundleno = 445 (0x1bd), region = 48  ;;  %1987 = vmatprep.subr.mxu0 (!%p241_p9), %v1386_v0  ;;  %2037 = vmatprep.subr.mxu1 (!%p241_p9), %v1386_v0  ;;  %342 = vst.msk [vmem:[#allocation2] sm:$0xff] (!%p241_p9), %vm341_vm0, %v2156_v1  ;;  %343 = vst.msk [vmem:[#allocation2 + $0x8] sm:$0xff] (!%p241_p9), %vm341_vm0, %v2156_v1  ;;  %v2317_v2 = vld [vmem:[%s3512_s1] ss:$0 sm:$0xff] (!%p241_p9)  ;;  %s1899_s13 = sshll.u32 (!%p241_p9), %s269_s29, 8 }
   0xf   : > { %346 = vst.msk [vmem:[#allocation2 + $0x18] sm:$0xff] (!%p241_p9), %vm341_vm0, %v2156_v1  ;;  %347 = vst.msk [vmem:[#allocation2 + $0x20] sm:$0xff] (!%p241_p9), %vm341_vm0, %v2156_v1  ;;  %1988 = vmatpush3.msra.mxu0 (!%p241_p9), %v1386_v0  ;;  %2038 = vmatpush3.msra.mxu1 (!%p241_p9), %v1386_v0  ;;  %v2322_v3 = vld [vmem:[%s3512_s1 + $0x1] ss:$0 sm:$0xff] (!%p241_p9)  ;;  %v2327_v4 = vld [vmem:[%s3512_s1 + $0x2] ss:$0 sm:$0xff] (!%p241_p9) }
  0x10   : > { %348 = vst.msk [vmem:[#allocation2 + $0x28] sm:$0x3] (!%p241_p9), %vm344_vm1, %v2156_v1  ;;  %351 = vst.msk [vmem:[#allocation2 + $0x40] sm:$0x3] (!%p241_p9), %vm344_vm1, %v2156_v1  ;;  %v2355_v38 = vld [vmem:[%s3512_s1 + $0x3] ss:$0 sm:$0xff] (!%p241_p9) }
  0x11   : > { %349 = vst.msk [vmem:[#allocation2 + $0x30] sm:$0xff] (!%p241_p9), %vm341_vm0, %v2156_v1  ;;  %350 = vst.msk [vmem:[#allocation2 + $0x38] sm:$0xff] (!%p241_p9), %vm341_vm0, %v2156_v1  ;;  %v2360_v39 = vld [vmem:[%s3512_s1 + $0x4] ss:$0 sm:$0xff] (!%p241_p9)  ;;  %v2369_v47 = vld [vmem:[%s3512_s1 + $0x5] ss:$0 sm:$0xff] (!%p241_p9) }
  0x12   : > { %345 = vst.msk [vmem:[#allocation2 + $0x10] sm:$0x3] (!%p241_p9), %vm344_vm1, %v2156_v1  ;;  %354 = vst.msk [vmem:[#allocation2 + $0x58] sm:$0x3] (!%p241_p9), %vm344_vm1, %v2156_v1  ;;  %v2374_v48 = vld [vmem:[%s3512_s1 + $0x6] ss:$0 sm:$0xff] (!%p241_p9) }
  0x13   : > { %352 = vst.msk [vmem:[#allocation2 + $0x48] sm:$0xff] (!%p241_p9), %vm341_vm0, %v2156_v1  ;;  %353 = vst.msk [vmem:[#allocation2 + $0x50] sm:$0xff] (!%p241_p9), %vm341_vm0, %v2156_v1  ;;  %v2385_v56 = vld [vmem:[%s3512_s1 + $0x7] ss:$0 sm:$0xff] (!%p241_p9)  ;;  %v2396_v0 = vld [vmem:[%s3512_s1 + $0x8] ss:$0 sm:$0xff] (!%p241_p9) }
  0x14   : > { %355 = vst.msk [vmem:[#allocation2 + $0x60] sm:$0xff] (!%p241_p9), %vm341_vm0, %v2156_v1  ;;  %356 = vst.msk [vmem:[#allocation2 + $0x68] sm:$0xff] (!%p241_p9), %vm341_vm0, %v2156_v1  ;;  %vm1786_vm2 = vcmask (!%p241_p9), 130048   ;;  %s1953_s17 = sshll.u32 (!%p241_p9), %s2221_s28, 12  ;;  %s2157_s23 = smov (!%p241_p9), [#allocation3]  }
  0x15   : > { %357 = vst.msk [vmem:[#allocation2 + $0x70] sm:$0x3] %vm344_vm1, %v2156_v1  ;;  %360 = vst.msk [vmem:[#allocation2 + $0x88] sm:$0x3] %vm344_vm1, %v2156_v1  ;;  %s273_s15 = scalar_select %p272_p10, %s2221_s28, 1  ;;  %v430_v15 = vld [vmem:[#allocation2] sm:$0xff] }
  0x16   : > { %358 = vst.msk [vmem:[#allocation2 + $0x78] sm:$0xff] %vm341_vm0, %v2156_v1  ;;  %359 = vst.msk [vmem:[#allocation2 + $0x80] sm:$0xff] %vm341_vm0, %v2156_v1  ;;  %v499_v16 = vld [vmem:[#allocation2 + $0x1] sm:$0xff]  ;;  %v467_v20 = vmul.f32 %v2317_v2, %v430_v15  ;;  %s3459_s21 = scalar_lea.hbm %s3518_s7, %s1953_s17  ;;  %s3470_s28 = scalar_lea.sflag [#allocation4], %s269_s29 }
  0x17   : > { %361 = vst.msk [vmem:[#allocation2 + $0x90] sm:$0xff] %vm341_vm0, %v2156_v1  ;;  %362 = vst.msk [vmem:[#allocation2 + $0x98] sm:$0xff] %vm341_vm0, %v2156_v1  ;;  %s1952_s16 = sshll.u32 %s273_s15, 8  ;;  %v600_v17 = vld [vmem:[#allocation2 + $0x2] sm:$0xff]  ;;  %v536_v21 = vmul.f32 %v2322_v3, %v499_v16  ;;  %s2096_s8 = sshll.u32 %s2157_s23, 4  ;;  %s2097_s8 = int_to_ptr.vmem [resolvable:$false] %s2096_s8 }
  0x18   : > { %363 = vst.msk [vmem:[#allocation2 + $0xa0] sm:$0x3] %vm344_vm1, %v2156_v1  ;;  %366 = vst.msk [vmem:[#allocation2 + $0xb8] sm:$0x3] %vm344_vm1, %v2156_v1  ;;  %s2312_s19 = scalar_lea.vmem %s3511_s0, %s1952_s16  ;;  %v431_v22 = vld [vmem:[#allocation2 + $0x8] sm:$0xff]  ;;  %v637_v25 = vmul.f32 %v2327_v4, %v600_v17  ;;  %s3333_s16 = scalar_lea.vmem [#allocation3], %s1899_s13 }
  0x19   : > { %364 = vst.msk [vmem:[#allocation2 + $0xa8] sm:$0xff] %vm341_vm0, %v2156_v1  ;;  %365 = vst.msk [vmem:[#allocation2 + $0xb0] sm:$0xff] %vm341_vm0, %v2156_v1  ;;  %v277_v5 = vld [vmem:[%s2312_s19] sm:$0xff]  ;;  %v278_v6 = vld [vmem:[%s2312_s19 + $0x8] sm:$0xff]  ;;  %v468_v26 = vmul.f32 %v2317_v2, %v431_v22  ;;  %v568_v31 = vadd.f32 %v536_v21, %v467_v20  ;;  %s1833_s18 = sshll.u32 %s3333_s16, 4  ;;  %s2098_s9 = scalar_lea.vmem %s2097_s8, 8192  ;;  %s3461_s18 = int_to_ptr.vmem [resolvable:$true] %s1833_s18 }
  0x1a   : > { %367 = vst.msk [vmem:[#allocation2 + $0xc0] sm:$0xff] %vm341_vm0, %v2156_v1  ;;  %368 = vst.msk [vmem:[#allocation2 + $0xc8] sm:$0xff] %vm341_vm0, %v2156_v1  ;;  %v279_v7 = vld [vmem:[%s2312_s19 + $0x10] sm:$0xff]  ;;  %v280_v8 = vld [vmem:[%s2312_s19 + $0x18] sm:$0xff]  ;;  %v309_v9 = vmax.f32 %v277_v5, 0.0  ;;  %v310_v10 = vmax.f32 %v278_v6, 0.0  ;;  %p2099_p0 = scmp.lt.s32.totalorder %s3461_s18, %s2097_s8 }
  0x1b   : > { %369 = vst.msk [vmem:[#allocation2 + $0xd0] sm:$0x3] %vm344_vm1, %v2156_v1  ;;  %372 = vst.msk [vmem:[#allocation2 + $0xe8] sm:$0x3] %vm344_vm1, %v2156_v1  ;;  %v311_v11 = vmax.f32 %v279_v7, 0.0  ;;  %v291_v12 = vld [vmem:[%s2312_s19 + $0x70] sm:$0xff]  ;;  %v669_v63 = vadd.f32 %v637_v25, %v568_v31 }
  0x1c   : > { %370 = vst.msk [vmem:[#allocation2 + $0xd8] sm:$0xff] %vm341_vm0, %v2156_v1  ;;  %371 = vst.msk [vmem:[#allocation2 + $0xe0] sm:$0xff] %vm341_vm0, %v2156_v1  ;;  %v292_v13 = vld [vmem:[%s2312_s19 + $0x78] sm:$0xff]  ;;  %v312_v14 = vmax.f32 %v280_v8, 0.0  ;;  %v323_v18 = vmax.f32 %v291_v12, 0.0  ;;  %v500_v23 = vld [vmem:[#allocation2 + $0x9] sm:$0xff] }
  0x1d   : > { %373 = vst.msk [vmem:[#allocation2 + $0xf0] sm:$0xff] %vm341_vm0, %v2156_v1  ;;  %374 = vst.msk [vmem:[#allocation2 + $0xf8] sm:$0xff] %vm341_vm0, %v2156_v1  ;;  %v324_v19 = vmax.f32 %v292_v13, 0.0  ;;  %v601_v24 = vld [vmem:[#allocation2 + $0xa] sm:$0xff]  ;;  %v537_v27 = vmul.f32 %v2322_v3, %v500_v23  ;;  %v293_v28 = vld [vmem:[%s2312_s19 + $0x80] sm:$0xff]  ;;  %s2092_s22 = scalar_lea.vmem %s3461_s18, 4096 }
  0x1e   : > { %375 = vst.msk [vmem:[#allocation2 + $0x100] sm:$0x3] %vm344_vm1, %v2156_v1  ;;  %378 = vst.msk [vmem:[#allocation2 + $0x118] sm:$0x3] %vm344_vm1, %v2156_v1  ;;  %v294_v29 = vld [vmem:[%s2312_s19 + $0x88] sm:$0xff]  ;;  %v295_v30 = vld [vmem:[%s2312_s19 + $0x90] sm:$0xff]  ;;  %v638_v40 = vmul.f32 %v2327_v4, %v601_v24  ;;  %p2093_p11 = scmp.ne.s32.totalorder %s3461_s18, %s2092_s22  ;;  %p2100_p1 = scmp.lt.s32.totalorder %s2098_s9, %s2092_s22 }
  0x1f   : > { %376 = vst.msk [vmem:[#allocation2 + $0x108] sm:$0xff] %vm341_vm0, %v2156_v1  ;;  %377 = vst.msk [vmem:[#allocation2 + $0x110] sm:$0xff] %vm341_vm0, %v2156_v1  ;;  %v296_v32 = vld [vmem:[%s2312_s19 + $0x98] sm:$0xff]  ;;  %v325_v33 = vmax.f32 %v293_v28, 0.0  ;;  %v326_v34 = vmax.f32 %v294_v29, 0.0  ;;  %v327_v35 = vmax.f32 %v295_v30, 0.0  ;;  %v569_v49 = vadd.f32 %v537_v27, %v468_v26 }
  0x20   : > { %379 = vst.msk [vmem:[#allocation2 + $0x120] sm:$0xff] %vm341_vm0, %v2156_v1  ;;  %380 = vst.msk [vmem:[#allocation2 + $0x128] sm:$0xff] %vm341_vm0, %v2156_v1  ;;  %v281_v36 = vld [vmem:[%s2312_s19 + $0x20] sm:$0xff]  ;;  %v282_v37 = vld [vmem:[%s2312_s19 + $0x28] sm:$0xff]  ;;  %v328_v41 = vmax.f32 %v296_v32, 0.0  ;;  %p2094_p12 = pnand %p2093_p11, %p2238_p5  ;;  %p2101_p2 = por %p2100_p1, %p2099_p0 }
  0x21   : > { %381 = vst.msk [vmem:[#allocation2 + $0x130] sm:$0x3] %vm344_vm1, %v2156_v1  ;;  %384 = vst.msk [vmem:[#allocation2 + $0x148] sm:$0x3] %vm344_vm1, %v2156_v1  ;;  %v313_v42 = vmax.f32 %v281_v36, 0.0  ;;  %v314_v43 = vmax.f32 %v282_v37, 0.0  ;;  %v670_v20 = vadd.f32 %v638_v40, %v569_v49 }
  0x22   : > { %382 = vst.msk [vmem:[#allocation2 + $0x138] sm:$0xff] %vm341_vm0, %v2156_v1  ;;  %383 = vst.msk [vmem:[#allocation2 + $0x140] sm:$0xff] %vm341_vm0, %v2156_v1  ;;  %v297_v44 = vld [vmem:[%s2312_s19 + $0xa0] sm:$0xff]  ;;  %v298_v45 = vld [vmem:[%s2312_s19 + $0xa8] sm:$0xff]  ;;  %p2095_p13 = pneg %p2094_p12 }
  0x23   : > { %385 = vst.msk [vmem:[#allocation2 + $0x150] sm:$0xff] %vm341_vm0, %v2156_v1  ;;  %386 = vst.msk [vmem:[#allocation2 + $0x158] sm:$0xff] %vm341_vm0, %v2156_v1  ;;  %v283_v46 = vld [vmem:[%s2312_s19 + $0x30] sm:$0xff]  ;;  %v329_v50 = vmax.f32 %v297_v44, 0.0  ;;  %v330_v51 = vmax.f32 %v298_v45, 0.0  ;;  %v284_v52 = vld [vmem:[%s2312_s19 + $0x38] sm:$0xff] }
  0x24   : > { %387 = vst.msk [vmem:[#allocation2 + $0x160] sm:$0x3] %vm344_vm1, %v2156_v1  ;;  %390 = vst.msk [vmem:[#allocation2 + $0x178] sm:$0x3] %vm344_vm1, %v2156_v1  ;;  %v315_v53 = vmax.f32 %v283_v46, 0.0  ;;  %v299_v54 = vld [vmem:[%s2312_s19 + $0xb0] sm:$0xff]  ;;  %p2102_p3 = pnand %p2101_p2, %p2095_p13 }
  0x25   : > { %388 = vst.msk [vmem:[#allocation2 + $0x168] sm:$0xff] %vm341_vm0, %v2156_v1  ;;  %389 = vst.msk [vmem:[#allocation2 + $0x170] sm:$0xff] %vm341_vm0, %v2156_v1  ;;  %v300_v55 = vld [vmem:[%s2312_s19 + $0xb8] sm:$0xff]  ;;  %v316_v57 = vmax.f32 %v284_v52, 0.0  ;;  %v331_v58 = vmax.f32 %v299_v54, 0.0  ;;  %v285_v60 = vld [vmem:[%s2312_s19 + $0x40] sm:$0xff] }
  0x26   : > { %391 = vst.msk [vmem:[#allocation2 + $0x180] sm:$0xff] %vm341_vm0, %v2156_v1  ;;  %392 = vst.msk [vmem:[#allocation2 + $0x188] sm:$0xff] %vm341_vm0, %v2156_v1  ;;  %v332_v59 = vmax.f32 %v300_v55, 0.0  ;;  %v286_v61 = vld [vmem:[%s2312_s19 + $0x48] sm:$0xff]  ;;  %v301_v62 = vld [vmem:[%s2312_s19 + $0xc0] sm:$0xff] }
  0x27   : > { %393 = vst.msk [vmem:[#allocation2 + $0x190] sm:$0x3] %vm344_vm1, %v2156_v1  ;;  %396 = vst.msk [vmem:[#allocation2 + $0x1a8] sm:$0x3] %vm344_vm1, %v2156_v1  ;;  %v318_v5 = vmax.f32 %v286_v61, 0.0  ;;  %v302_v6 = vld [vmem:[%s2312_s19 + $0xc8] sm:$0xff] }
  0x28   : > { %394 = vst.msk [vmem:[#allocation2 + $0x198] sm:$0xff] %vm341_vm0, %v2156_v1  ;;  %395 = vst.msk [vmem:[#allocation2 + $0x1a0] sm:$0xff] %vm341_vm0, %v2156_v1  ;;  %v317_v1 = vmax.f32 %v285_v60, 0.0  ;;  %v333_v7 = vmax.f32 %v301_v62, 0.0  ;;  %v287_v8 = vld [vmem:[%s2312_s19 + $0x50] sm:$0xff]  ;;  %v334_v12 = vmax.f32 %v302_v6, 0.0 }
  0x29   : > { %398 = vst.msk [vmem:[#allocation2 + $0x19] sm:$0xff] %vm341_vm0, %v309_v9  ;;  %399 = vst.msk [vmem:[#allocation2 + $0x21] sm:$0xff] %vm341_vm0, %v310_v10  ;;  %v288_v9 = vld [vmem:[%s2312_s19 + $0x58] sm:$0xff]  ;;  %v319_v13 = vmax.f32 %v287_v8, 0.0 }
  0x2a   : > { %400 = vst.msk [vmem:[#allocation2 + $0x31] sm:$0xff] %vm341_vm0, %v311_v11  ;;  %401 = vst.msk [vmem:[#allocation2 + $0x39] sm:$0xff] %vm341_vm0, %v312_v14  ;;  %v320_v14 = vmax.f32 %v288_v9, 0.0 }
  0x2b   : > { %412 = vst.msk [vmem:[#allocation2 + $0xc1] sm:$0xff] %vm341_vm0, %v323_v18  ;;  %413 = vst.msk [vmem:[#allocation2 + $0xc9] sm:$0xff] %vm341_vm0, %v324_v19 }
  0x2c   : > { %414 = vst.msk [vmem:[#allocation2 + $0xd9] sm:$0xff] %vm341_vm0, %v325_v33  ;;  %415 = vst.msk [vmem:[#allocation2 + $0xe1] sm:$0xff] %vm341_vm0, %v326_v34 }
  0x2d   : > { %416 = vst.msk [vmem:[#allocation2 + $0xf1] sm:$0xff] %vm341_vm0, %v327_v35  ;;  %417 = vst.msk [vmem:[#allocation2 + $0xf9] sm:$0xff] %vm341_vm0, %v328_v41 }
  0x2e   : > { %402 = vst.msk [vmem:[#allocation2 + $0x49] sm:$0xff] %vm341_vm0, %v313_v42  ;;  %403 = vst.msk [vmem:[#allocation2 + $0x51] sm:$0xff] %vm341_vm0, %v314_v43 }
  0x2f   : > { %418 = vst.msk [vmem:[#allocation2 + $0x109] sm:$0xff] %vm341_vm0, %v329_v50  ;;  %419 = vst.msk [vmem:[#allocation2 + $0x111] sm:$0xff] %vm341_vm0, %v330_v51 }
  0x30   : > { %404 = vst.msk [vmem:[#allocation2 + $0x61] sm:$0xff] %vm341_vm0, %v315_v53  ;;  %v701_v10 = vld [vmem:[#allocation2 + $0x18] sm:$0xff]  ;;  %405 = vst.msk [vmem:[#allocation2 + $0x69] sm:$0xff] %vm341_vm0, %v316_v57  ;;  %v2424_v24 = vld [vmem:[#allocation2 + $0x20] sm:$0xff] }
  0x31   : > { %v802_v11 = vld [vmem:[#allocation2 + $0x19] sm:$0xff]  ;;  %420 = vst.msk [vmem:[#allocation2 + $0x121] sm:$0xff] %vm341_vm0, %v331_v58  ;;  %421 = vst.msk [vmem:[#allocation2 + $0x129] sm:$0xff] %vm341_vm0, %v332_v59  ;;  %v738_v15 = vmul.f32 %v2355_v38, %v701_v10  ;;  %v2411_v18 = vld [vmem:[#allocation2 + $0x30] sm:$0xff]  ;;  %v469_v26 = vmul.f32 %v2317_v2, %v701_v10  ;;  %v739_v30 = vmul.f32 %v2355_v38, %v2424_v24 }
  0x32   : > { %v839_v16 = vmul.f32 %v2360_v39, %v802_v11  ;;  %v2409_v17 = vld [vmem:[#allocation2 + $0x1a] sm:$0xff]  ;;  %v2413_v19 = vld [vmem:[#allocation2 + $0x31] sm:$0xff]  ;;  %406 = vst.msk [vmem:[#allocation2 + $0x79] sm:$0xff] %vm341_vm0, %v317_v1  ;;  %407 = vst.msk [vmem:[#allocation2 + $0x81] sm:$0xff] %vm341_vm0, %v318_v5  ;;  %v1042_v22 = vmul.f32 %v2374_v48, %v2411_v18  ;;  %v538_v27 = vmul.f32 %v2322_v3, %v802_v11 }
  0x33   : > { %422 = vst.msk [vmem:[#allocation2 + $0x139] sm:$0xff] %vm341_vm0, %v333_v7  ;;  %v940_v21 = vmul.f32 %v2369_v47, %v2409_v17  ;;  %v2422_v23 = vld [vmem:[#allocation2 + $0x32] sm:$0xff]  ;;  %v2426_v25 = vld [vmem:[#allocation2 + $0x21] sm:$0xff]  ;;  %423 = vst.msk [vmem:[#allocation2 + $0x141] sm:$0xff] %vm341_vm0, %v334_v12  ;;  %v770_v28 = vadd.f32 %v738_v15, %v669_v63  ;;  %v1143_v29 = vmul.f32 %v2385_v56, %v2413_v19 }
  0x34   : > { %408 = vst.msk [vmem:[#allocation2 + $0x91] sm:$0xff] %vm341_vm0, %v319_v13  ;;  %409 = vst.msk [vmem:[#allocation2 + $0x99] sm:$0xff] %vm341_vm0, %v320_v14  ;;  %v840_v31 = vmul.f32 %v2360_v39, %v2426_v25  ;;  %v2439_v32 = vld [vmem:[#allocation2 + $0x22] sm:$0xff]  ;;  %v2441_v33 = vld [vmem:[#allocation2 + $0x38] sm:$0xff]  ;;  %v1244_v35 = vmul.f32 %v2396_v0, %v2422_v23  ;;  %v771_v45 = vadd.f32 %v739_v30, %v670_v20 }
  0x35   : > { %v2443_v34 = vld [vmem:[#allocation2 + $0x39] sm:$0xff]  ;;  %v941_v36 = vmul.f32 %v2369_v47, %v2439_v32  ;;  %v1043_v37 = vmul.f32 %v2374_v48, %v2441_v33  ;;  %v515_v42 = vld [vmem:[#allocation2 + $0xc1] sm:$0xff]  ;;  %v871_v44 = vadd.f32 %v839_v16, %v770_v28  ;;  %v2468_v58 = vld [vmem:[#allocation2 + $0xf0] sm:$0xff]  ;;  %v570_v59 = vadd.f32 %v538_v27, %v469_v26 }
  0x36   : > { %v1144_v40 = vmul.f32 %v2385_v56, %v2443_v34  ;;  %v446_v41 = vld [vmem:[#allocation2 + $0xc0] sm:$0xff]  ;;  %v552_v50 = vmul.f32 %v2322_v3, %v515_v42  ;;  %v2457_v51 = vld [vmem:[#allocation2 + $0xd8] sm:$0xff]  ;;  %v872_v61 = vadd.f32 %v840_v31, %v771_v45  ;;  %v447_v1 = vld [vmem:[#allocation2 + $0xc8] sm:$0xff]  ;;  %v1058_v8 = vmul.f32 %v2374_v48, %v2468_v58 }
  0x37   : > { %v616_v43 = vld [vmem:[#allocation2 + $0xc2] sm:$0xff]  ;;  %v2453_v46 = vld [vmem:[#allocation2 + $0x3a] sm:$0xff]  ;;  %v483_v49 = vmul.f32 %v2317_v2, %v446_v41  ;;  %v754_v54 = vmul.f32 %v2355_v38, %v2457_v51  ;;  %v972_v60 = vadd.f32 %v940_v21, %v871_v44  ;;  %v617_v6 = vld [vmem:[#allocation2 + $0xca] sm:$0xff]  ;;  %v484_v9 = vmul.f32 %v2317_v2, %v447_v1 }
  0x38   : > { %v1245_v52 = vmul.f32 %v2396_v0, %v2453_v46  ;;  %v653_v53 = vmul.f32 %v2327_v4, %v616_v43  ;;  %v2464_v55 = vld [vmem:[#allocation2 + $0xd9] sm:$0xff]  ;;  %v516_v5 = vld [vmem:[#allocation2 + $0xc9] sm:$0xff]  ;;  %v973_v13 = vadd.f32 %v941_v36, %v872_v61  ;;  %v2480_v15 = vld [vmem:[#allocation2 + $0xf1] sm:$0xff]  ;;  %v654_v20 = vmul.f32 %v2327_v4, %v617_v6 }
  0x39   : > { %v2466_v57 = vld [vmem:[#allocation2 + $0xda] sm:$0xff]  ;;  %v584_v62 = vadd.f32 %v552_v50, %v483_v49  ;;  %v855_v63 = vmul.f32 %v2360_v39, %v2464_v55  ;;  %v553_v10 = vmul.f32 %v2322_v3, %v516_v5  ;;  %v1074_v12 = vadd.f32 %v1042_v22, %v972_v60  ;;  %v2482_v16 = vld [vmem:[#allocation2 + $0xf2] sm:$0xff]  ;;  %v2495_v42 = vld [vmem:[#allocation2 + $0xe2] sm:$0xff] }
  0x3a   : > { %v956_v7 = vmul.f32 %v2369_v47, %v2466_v57  ;;  %v2478_v11 = vld [vmem:[#allocation2 + $0xe0] sm:$0xff]  ;;  %v1159_v21 = vmul.f32 %v2385_v56, %v2480_v15  ;;  %v1260_v26 = vmul.f32 %v2396_v0, %v2482_v16  ;;  %v1075_v31 = vadd.f32 %v1043_v37, %v973_v13  ;;  %v2497_v43 = vld [vmem:[#allocation2 + $0xf8] sm:$0xff] }
  0x3b   : > { %v685_v14 = vadd.f32 %v653_v53, %v584_v62  ;;  %v585_v27 = vadd.f32 %v553_v10, %v484_v9  ;;  %v755_v28 = vmul.f32 %v2355_v38, %v2478_v11  ;;  %v2491_v30 = vld [vmem:[#allocation2 + $0xe1] sm:$0xff]  ;;  %v1175_v22 = vadd.f32 %v1143_v29, %v1074_v12  ;;  %v2502_v44 = vld [vmem:[%s3513_s2] ss:$0 sm:$0xff] }
  0x3c   : > { %v856_v41 = vmul.f32 %v2360_v39, %v2491_v30  ;;  %v957_v49 = vmul.f32 %v2369_v47, %v2495_v42  ;;  %v1059_v29 = vmul.f32 %v2374_v48, %v2497_v43  ;;  %v639_v37 = vmul.f32 %v2327_v4, %v2409_v17  ;;  %v2510_v60 = vld [vmem:[#allocation2 + $0xf9] sm:$0xff]  ;;  %v2528_v12 = vld [vmem:[#allocation2 + $0x48] sm:$0xff] }
  0x3d   : > { %v786_v36 = vadd.f32 %v754_v54, %v685_v14  ;;  %v686_v45 = vadd.f32 %v654_v20, %v585_v27  ;;  %v1276_v50 = vadd.f32 %v1244_v35, %v1175_v22  ;;  %v1176_v53 = vadd.f32 %v1144_v40, %v1075_v31  ;;  %v2517_v62 = vld [vmem:[%s3514_s3] ss:$0 sm:$0xff] }
  0x3e   : > { %v740_v61 = vmul.f32 %v2355_v38, %v2411_v18  ;;  %v1160_v5 = vmul.f32 %v2385_v56, %v2510_v60  ;;  %v2521_v6 = vld [vmem:[#allocation2 + $0xfa] sm:$0xff]  ;;  %v671_v17 = vadd.f32 %v639_v37, %v570_v59  ;;  %v841_v35 = vmul.f32 %v2360_v39, %v2413_v19 }
  0x3f   : > { %v887_v54 = vadd.f32 %v855_v63, %v786_v36  ;;  %v787_v1 = vadd.f32 %v755_v28, %v686_v45  ;;  %v1315_v40 = vmul.f32 %v2502_v44, %v1276_v50  ;;  %v1277_v63 = vadd.f32 %v1245_v52, %v1176_v53  ;;  %v2538_v36 = vld [vmem:[#allocation2 + $0x49] sm:$0xff] }
  0x40   : > { %v1261_v10 = vmul.f32 %v2396_v0, %v2521_v6  ;;  %v772_v14 = vadd.f32 %v740_v61, %v671_v17  ;;  %v942_v20 = vmul.f32 %v2369_v47, %v2422_v23  ;;  %v1044_v59 = vmul.f32 %v2374_v48, %v2528_v12 }
  0x41   : > { %v988_v9 = vadd.f32 %v956_v7, %v887_v54  ;;  %v888_v13 = vadd.f32 %v856_v41, %v787_v1  ;;  %v1354_v27 = vadd.f32 %v2517_v62, %v1315_v40  ;;  %v1316_v28 = vmul.f32 %v2502_v44, %v1277_v63  ;;  %v2540_v41 = vld [vmem:[#allocation2 + $0x4a] sm:$0xff] }
  0x42   : > { %v470_v52 = vmul.f32 %v2317_v2, %v2424_v24  ;;  %v873_v31 = vadd.f32 %v841_v35, %v772_v14  ;;  %v539_v45 = vmul.f32 %v2322_v3, %v2426_v25  ;;  %v640_v37 = vmul.f32 %v2327_v4, %v2439_v32  ;;  %v2554_v1 = vld [vmem:[#allocation2 + $0x50] sm:$0xff] }
  0x43   : > { %v1090_v22 = vadd.f32 %v1058_v8, %v988_v9  ;;  %v989_v7 = vadd.f32 %v957_v49, %v888_v13  ;;  %1989 = vmatprep.mubr.msk.f32.mxu0 %vm341_vm0, %v1354_v27  ;;  %v1355_v50 = vadd.f32 %v2517_v62, %v1316_v28  ;;  %v1145_v24 = vmul.f32 %v2385_v56, %v2538_v36  ;;  %v2563_v9 = vld [vmem:[#allocation2 + $0x51] sm:$0xff] }
  0x44   : > { %v1246_v49 = vmul.f32 %v2396_v0, %v2540_v41  ;;  %v974_v54 = vadd.f32 %v942_v20, %v873_v31  ;;  %v571_v61 = vadd.f32 %v539_v45, %v470_v52  ;;  %v741_v25 = vmul.f32 %v2355_v38, %v2441_v33  ;;  %v2570_v20 = vld [vmem:[#allocation2 + $0x52] sm:$0xff] }
  0x45   : > { %v1191_v8 = vadd.f32 %v1159_v21, %v1090_v22  ;;  %v1091_v53 = vadd.f32 %v1059_v29, %v989_v7  ;;  %1990 = vmatmul.mubr.msk.f32.vlgmr.msra.gmra.mrb[0].mxu0 %vm341_vm0, %v1355_v50  ;;  %v842_v21 = vmul.f32 %v2360_v39, %v2443_v34  ;;  %v943_v17 = vmul.f32 %v2369_v47, %v2453_v46 }
  0x46   : > { %v1045_v35 = vmul.f32 %v2374_v48, %v2554_v1  ;;  %v1076_v40 = vadd.f32 %v1044_v59, %v974_v54  ;;  %v672_v63 = vadd.f32 %v640_v37, %v571_v61  ;;  %v485_v13 = vmul.f32 %v2317_v2, %v2457_v51 }
  0x47   : > { %v1292_v32 = vadd.f32 %v1260_v26, %v1191_v8  ;;  %v1192_v29 = vadd.f32 %v1160_v5, %v1091_v53  ;;  %v1146_v26 = vmul.f32 %v2385_v56, %v2563_v9  ;;  %v554_v27 = vmul.f32 %v2322_v3, %v2464_v55 }
  0x48   : > { %v655_v5 = vmul.f32 %v2327_v4, %v2466_v57  ;;  %v1177_v28 = vadd.f32 %v1145_v24, %v1076_v40  ;;  %v773_v22 = vadd.f32 %v741_v25, %v672_v63  ;;  %v1247_v52 = vmul.f32 %v2396_v0, %v2570_v20  ;;  %v2603_v63 = vld [vmem:[#allocation2 + $0x10a] sm:$0xff] }
  0x49   : > { %v1331_v14 = vmul.f32 %v2502_v44, %v1292_v32  ;;  %v1293_v59 = vadd.f32 %v1261_v10, %v1192_v29  ;;  %v586_v7 = vadd.f32 %v554_v27, %v485_v13  ;;  %v756_v31 = vmul.f32 %v2355_v38, %v2468_v58  ;;  %v2586_v10 = vld [vmem:[#allocation2 + $0x108] sm:$0xff]  ;;  %v2613_v27 = vld [vmem:[#allocation2 + $0x110] sm:$0xff] }
  0x4a   : > { %v857_v45 = vmul.f32 %v2360_v39, %v2480_v15  ;;  %v1278_v37 = vadd.f32 %v1246_v49, %v1177_v28  ;;  %v874_v50 = vadd.f32 %v842_v21, %v773_v22  ;;  %v958_v57 = vmul.f32 %v2369_v47, %v2482_v16  ;;  %v2597_v32 = vld [vmem:[#allocation2 + $0x109] sm:$0xff] }
  0x4b   : > { %v1370_v51 = vadd.f32 %v2517_v62, %v1331_v14  ;;  %v1332_v55 = vmul.f32 %v2502_v44, %v1293_v59  ;;  %v687_v8 = vadd.f32 %v655_v5, %v586_v7  ;;  %v1060_v24 = vmul.f32 %v2374_v48, %v2586_v10  ;;  %v2622_v7 = vld [vmem:[#allocation2 + $0x112] sm:$0xff] }
  0x4c   : > { %v486_v53 = vmul.f32 %v2317_v2, %v2478_v11  ;;  %v555_v54 = vmul.f32 %v2322_v3, %v2491_v30  ;;  %v1317_v61 = vmul.f32 %v2502_v44, %v1278_v37  ;;  %v975_v25 = vadd.f32 %v943_v17, %v874_v50 }
  0x4d   : > { %2013 = vmatprep.mubr.msk.f32.mxu1 %vm341_vm0, %v1370_v51  ;;  %v1371_v49 = vadd.f32 %v2517_v62, %v1332_v55  ;;  %v656_v21 = vmul.f32 %v2327_v4, %v2495_v42  ;;  %v788_v29 = vadd.f32 %v756_v31, %v687_v8  ;;  %v1161_v40 = vmul.f32 %v2385_v56, %v2597_v32 }
  0x4e   : > { %v587_v11 = vadd.f32 %v555_v54, %v486_v53  ;;  %v757_v30 = vmul.f32 %v2355_v38, %v2497_v43  ;;  %v1356_v13 = vadd.f32 %v2517_v62, %v1317_v61  ;;  %v1077_v17 = vadd.f32 %v1045_v35, %v975_v25  ;;  %v2620_v35 = vld [vmem:[#allocation2 + $0x111] sm:$0xff] }
  0x4f   : > { %2014 = vmatmul.mubr.msk.f32.vlgmr.msra.gmra.mrb[0].mxu1 %vm341_vm0, %v1371_v49  ;;  %v1262_v14 = vmul.f32 %v2396_v0, %v2603_v63  ;;  %v858_v42 = vmul.f32 %v2360_v39, %v2510_v60  ;;  %v889_v5 = vadd.f32 %v857_v45, %v788_v29  ;;  %v959_v28 = vmul.f32 %v2369_v47, %v2521_v6  ;;  %v2645_v29 = vld [vmem:[#allocation2 + $0x61] sm:$0xff] }
  0x50   : > { %v688_v59 = vadd.f32 %v656_v21, %v587_v11  ;;  %v1061_v22 = vmul.f32 %v2374_v48, %v2613_v27  ;;  %1992 = vmatprep.mubr.msk.f32.mxu0 %vm341_vm0, %v1356_v13  ;;  %v1178_v51 = vadd.f32 %v1146_v26, %v1077_v17  ;;  %v471_v31 = vmul.f32 %v2317_v2, %v2411_v18 }
  0x51   : > { %v540_v45 = vmul.f32 %v2322_v3, %v2413_v19  ;;  %v641_v55 = vmul.f32 %v2327_v4, %v2422_v23  ;;  %v990_v37 = vadd.f32 %v958_v57, %v889_v5  ;;  %v1162_v8 = vmul.f32 %v2385_v56, %v2620_v35  ;;  %v2638_v19 = vld [vmem:[#allocation2 + $0x60] sm:$0xff] }
  0x52   : > { %v789_v50 = vadd.f32 %v757_v30, %v688_v59  ;;  %v1263_v26 = vmul.f32 %v2396_v0, %v2622_v7  ;;  %v1279_v53 = vadd.f32 %v1247_v52, %v1178_v51  ;;  %v742_v49 = vmul.f32 %v2355_v38, %v2528_v12  ;;  %v2656_v51 = vld [vmem:[#allocation2 + $0x62] sm:$0xff] }
  0x53   : > { %v572_v54 = vadd.f32 %v540_v45, %v471_v31  ;;  %v843_v18 = vmul.f32 %v2360_v39, %v2538_v36  ;;  %v1092_v61 = vadd.f32 %v1060_v24, %v990_v37  ;;  %v944_v57 = vmul.f32 %v2369_v47, %v2540_v41 }
  0x54   : > { %v890_v23 = vadd.f32 %v858_v42, %v789_v50  ;;  %v1046_v25 = vmul.f32 %v2374_v48, %v2638_v19  ;;  %v1318_v21 = vmul.f32 %v2502_v44, %v1279_v53  ;;  %v472_v11 = vmul.f32 %v2317_v2, %v2441_v33 }
  0x55   : > { %v673_v52 = vadd.f32 %v641_v55, %v572_v54  ;;  %v541_v30 = vmul.f32 %v2322_v3, %v2443_v34  ;;  %v1193_v13 = vadd.f32 %v1161_v40, %v1092_v61  ;;  %v1147_v17 = vmul.f32 %v2385_v56, %v2645_v29  ;;  %v2672_v54 = vld [vmem:[#allocation2 + $0x69] sm:$0xff] }
  0x56   : > { %v991_v24 = vadd.f32 %v959_v28, %v890_v23  ;;  %v642_v42 = vmul.f32 %v2327_v4, %v2453_v46  ;;  %v1357_v5 = vadd.f32 %v2517_v62, %v1318_v21  ;;  %v743_v33 = vmul.f32 %v2355_v38, %v2554_v1  ;;  %v2664_v28 = vld [vmem:[#allocation2 + $0x68] sm:$0xff] }
  0x57   : > { %v774_v59 = vadd.f32 %v742_v49, %v673_v52  ;;  %v573_v31 = vadd.f32 %v541_v30, %v472_v11  ;;  %v1294_v45 = vadd.f32 %v1262_v14, %v1193_v13  ;;  %v1248_v34 = vmul.f32 %v2396_v0, %v2656_v51 }
  0x58   : > { %v1093_v55 = vadd.f32 %v1061_v22, %v991_v24  ;;  %v844_v40 = vmul.f32 %v2360_v39, %v2563_v9  ;;  %1993 = vmatmul.mubr.msk.f32.gmra.mrb[2].mxu0 %vm341_vm0, %v1357_v5  ;;  %v945_v50 = vmul.f32 %v2369_v47, %v2570_v20  ;;  %v1047_v53 = vmul.f32 %v2374_v48, %v2664_v28  ;;  %v2691_v5 = vld [vmem:[#allocation2 + $0x120] sm:$0xff] }
  0x59   : > { %v875_v46 = vadd.f32 %v843_v18, %v774_v59  ;;  %v674_v37 = vadd.f32 %v642_v42, %v573_v31  ;;  %v1333_v14 = vmul.f32 %v2502_v44, %v1294_v45  ;;  %v487_v49 = vmul.f32 %v2317_v2, %v2468_v58  ;;  %v2699_v45 = vld [vmem:[#allocation2 + $0x121] sm:$0xff] }
  0x5a   : > { %v1194_v22 = vadd.f32 %v1162_v8, %v1093_v55  ;;  %v556_v61 = vmul.f32 %v2322_v3, %v2480_v15  ;;  %v1148_v21 = vmul.f32 %v2385_v56, %v2672_v54  ;;  %v657_v52 = vmul.f32 %v2327_v4, %v2482_v16  ;;  %v2683_v8 = vld [vmem:[#allocation2 + $0x6a] sm:$0xff] }
  0x5b   : > { %v976_v23 = vadd.f32 %v944_v57, %v875_v46  ;;  %v775_v18 = vadd.f32 %v743_v33, %v674_v37  ;;  %v1372_v11 = vadd.f32 %v2517_v62, %v1333_v14  ;;  %v758_v58 = vmul.f32 %v2355_v38, %v2586_v10 }
  0x5c   : > { %v1295_v30 = vadd.f32 %v1263_v26, %v1194_v22  ;;  %v588_v13 = vadd.f32 %v556_v61, %v487_v49  ;;  %v1249_v15 = vmul.f32 %v2396_v0, %v2683_v8  ;;  %v859_v57 = vmul.f32 %v2360_v39, %v2597_v32 }
  0x5d   : > { %v1078_v24 = vadd.f32 %v1046_v25, %v976_v23  ;;  %v876_v42 = vadd.f32 %v844_v40, %v775_v18  ;;  %2016 = vmatprep.mubr.msk.f32.mxu1 %vm341_vm0, %v1372_v11  ;;  %v960_v59 = vmul.f32 %v2369_v47, %v2603_v63  ;;  %v1062_v25 = vmul.f32 %v2374_v48, %v2691_v5 }
  0x5e   : > { %v1334_v16 = vmul.f32 %v2502_v44, %v1295_v30  ;;  %v689_v26 = vadd.f32 %v657_v52, %v588_v13  ;;  %v488_v55 = vmul.f32 %v2317_v2, %v2497_v43  ;;  %v557_v40 = vmul.f32 %v2322_v3, %v2510_v60 }
  0x5f   : > { %v1179_v31 = vadd.f32 %v1147_v17, %v1078_v24  ;;  %v977_v33 = vadd.f32 %v945_v50, %v876_v42  ;;  %v1163_v14 = vmul.f32 %v2385_v56, %v2699_v45  ;;  %v658_v22 = vmul.f32 %v2327_v4, %v2521_v6  ;;  %v2710_v50 = vld [vmem:[#allocation2 + $0x122] sm:$0xff] }
  0x60   : > { %v1373_v46 = vadd.f32 %v2517_v62, %v1334_v16  ;;  %v790_v37 = vadd.f32 %v758_v58, %v689_v26  ;;  %v589_v61 = vadd.f32 %v557_v40, %v488_v55  ;;  %v759_v43 = vmul.f32 %v2355_v38, %v2613_v27  ;;  %v2726_v58 = vld [vmem:[#allocation2 + $0x129] sm:$0xff] }
  0x61   : > { %v1280_v49 = vadd.f32 %v1248_v34, %v1179_v31  ;;  %v1079_v17 = vadd.f32 %v1047_v53, %v977_v33  ;;  %v1264_v23 = vmul.f32 %v2396_v0, %v2710_v50  ;;  %v860_v18 = vmul.f32 %v2360_v39, %v2620_v35  ;;  %v2721_v34 = vld [vmem:[#allocation2 + $0x128] sm:$0xff] }
  0x62   : > { %2017 = vmatmul.mubr.msk.f32.gmra.mrb[2].mxu1 %vm341_vm0, %v1373_v46  ;;  %v891_v60 = vadd.f32 %v859_v57, %v790_v37  ;;  %v961_v6 = vmul.f32 %v2369_v47, %v2622_v7  ;;  %v690_v11 = vadd.f32 %v658_v22, %v589_v61  ;;  %v1063_v30 = vmul.f32 %v2374_v48, %v2721_v34  ;;  %v2737_v33 = vld [vmem:[#allocation2 + $0x12a] sm:$0xff]  ;;  %v2749_v37 = vld [vmem:[#allocation2 + $0x78] sm:$0xff] }
  0x63   : > { %v1319_v53 = vmul.f32 %v2502_v44, %v1280_v49  ;;  %v1180_v52 = vadd.f32 %v1148_v21, %v1079_v17  ;;  %v473_v24 = vmul.f32 %v2317_v2, %v2528_v12  ;;  %v542_v42 = vmul.f32 %v2322_v3, %v2538_v36 }
  0x64   : > { %v992_v13 = vadd.f32 %v960_v59, %v891_v60  ;;  %v643_v57 = vmul.f32 %v2327_v4, %v2540_v41  ;;  %v791_v21 = vadd.f32 %v759_v43, %v690_v11  ;;  %v1164_v31 = vmul.f32 %v2385_v56, %v2726_v58  ;;  %v2756_v60 = vld [vmem:[#allocation2 + $0x79] sm:$0xff] }
  0x65   : > { %v1358_v16 = vadd.f32 %v2517_v62, %v1319_v53  ;;  %v1281_v26 = vadd.f32 %v1249_v15, %v1180_v52  ;;  %v1265_v55 = vmul.f32 %v2396_v0, %v2737_v33  ;;  %v574_v12 = vadd.f32 %v542_v42, %v473_v24 }
  0x66   : > { %v1094_v59 = vadd.f32 %v1062_v25, %v992_v13  ;;  %v744_v36 = vmul.f32 %v2355_v38, %v2638_v19  ;;  %v892_v40 = vadd.f32 %v860_v18, %v791_v21  ;;  %v845_v15 = vmul.f32 %v2360_v39, %v2645_v29  ;;  %v2758_v18 = vld [vmem:[#allocation2 + $0x7a] sm:$0xff] }
  0x67   : > { %1995 = vmatprep.mubr.msk.f32.mxu0 %vm341_vm0, %v1358_v16  ;;  %v1320_v41 = vmul.f32 %v2502_v44, %v1281_v26  ;;  %v946_v46 = vmul.f32 %v2369_v47, %v2656_v51  ;;  %v675_v22 = vadd.f32 %v643_v57, %v574_v12  ;;  %v1048_v49 = vmul.f32 %v2374_v48, %v2749_v37  ;;  %v2773_v57 = vld [vmem:[#allocation2 + $0x80] sm:$0xff] }
  0x68   : > { %v1195_v25 = vadd.f32 %v1163_v14, %v1094_v59  ;;  %v474_v17 = vmul.f32 %v2317_v2, %v2554_v1  ;;  %v993_v43 = vadd.f32 %v961_v6, %v892_v40  ;;  %v543_v53 = vmul.f32 %v2322_v3, %v2563_v9  ;;  %v2780_v59 = vld [vmem:[#allocation2 + $0x81] sm:$0xff] }
  0x69   : > { %v1359_v61 = vadd.f32 %v2517_v62, %v1320_v41  ;;  %v644_v14 = vmul.f32 %v2327_v4, %v2570_v20  ;;  %v776_v11 = vadd.f32 %v744_v36, %v675_v22  ;;  %v1149_v13 = vmul.f32 %v2385_v56, %v2756_v60 }
  0x6a   : > { %v1296_v52 = vadd.f32 %v1264_v23, %v1195_v25  ;;  %v1250_v1 = vmul.f32 %v2396_v0, %v2758_v18  ;;  %v1095_v6 = vadd.f32 %v1063_v30, %v993_v43  ;;  %v575_v24 = vadd.f32 %v543_v53, %v474_v17  ;;  %v2791_v17 = vld [vmem:[#allocation2 + $0x82] sm:$0xff] }
  0x6b   : > { %1996 = vmatmul.mubr.msk.f32.gmra.mrb[4].mxu0 %vm341_vm0, %v1359_v61  ;;  %v745_v42 = vmul.f32 %v2355_v38, %v2664_v28  ;;  %v846_v9 = vmul.f32 %v2360_v39, %v2672_v54  ;;  %v877_v23 = vadd.f32 %v845_v15, %v776_v11  ;;  %v947_v16 = vmul.f32 %v2369_v47, %v2683_v8 }
  0x6c   : > { %v1335_v20 = vmul.f32 %v2502_v44, %v1296_v52  ;;  %v1049_v26 = vmul.f32 %v2374_v48, %v2773_v57  ;;  %v1196_v21 = vadd.f32 %v1164_v31, %v1095_v6  ;;  %v676_v30 = vadd.f32 %v644_v14, %v575_v24 }
  0x6d   : > { %v489_v12 = vmul.f32 %v2317_v2, %v2586_v10  ;;  %v558_v36 = vmul.f32 %v2322_v3, %v2597_v32  ;;  %v978_v40 = vadd.f32 %v946_v46, %v877_v23  ;;  %v1150_v15 = vmul.f32 %v2385_v56, %v2780_v59 }
  0x6e   : > { %v1374_v41 = vadd.f32 %v2517_v62, %v1335_v20  ;;  %v659_v25 = vmul.f32 %v2327_v4, %v2603_v63  ;;  %v1297_v22 = vadd.f32 %v1265_v55, %v1196_v21  ;;  %v777_v31 = vadd.f32 %v745_v42, %v676_v30  ;;  %v2802_v55 = vld [vmem:[#allocation2 + $0x138] sm:$0xff] }
  0x6f   : > { %v590_v61 = vadd.f32 %v558_v36, %v489_v12  ;;  %v760_v10 = vmul.f32 %v2355_v38, %v2691_v5  ;;  %v1080_v32 = vadd.f32 %v1048_v49, %v978_v40  ;;  %v1251_v46 = vmul.f32 %v2396_v0, %v2791_v17  ;;  %v2807_v49 = vld [vmem:[#allocation2 + $0x139] sm:$0xff] }
  0x70   : > { %2019 = vmatprep.mubr.msk.f32.mxu1 %vm341_vm0, %v1374_v41  ;;  %v861_v43 = vmul.f32 %v2360_v39, %v2699_v45  ;;  %v962_v63 = vmul.f32 %v2369_v47, %v2710_v50  ;;  %v1336_v53 = vmul.f32 %v2502_v44, %v1297_v22  ;;  %v878_v14 = vadd.f32 %v846_v9, %v777_v31  ;;  %v2818_v12 = vld [vmem:[#allocation2 + $0x13a] sm:$0xff] }
  0x71   : > { %v691_v52 = vadd.f32 %v659_v25, %v590_v61  ;;  %v1064_v11 = vmul.f32 %v2374_v48, %v2802_v55  ;;  %v1181_v6 = vadd.f32 %v1149_v13, %v1080_v32  ;;  %v490_v24 = vmul.f32 %v2317_v2, %v2613_v27  ;;  %v2829_v25 = vld [vmem:[#allocation2 + $0x140] sm:$0xff] }
  0x72   : > { %v559_v42 = vmul.f32 %v2322_v3, %v2620_v35  ;;  %v660_v20 = vmul.f32 %v2327_v4, %v2622_v7  ;;  %v1375_v23 = vadd.f32 %v2517_v62, %v1336_v53  ;;  %v979_v21 = vadd.f32 %v947_v16, %v878_v14  ;;  %v2836_v32 = vld [vmem:[#allocation2 + $0x141] sm:$0xff] }
  0x73   : > { %v792_v9 = vadd.f32 %v760_v10, %v691_v52  ;;  %v1165_v30 = vmul.f32 %v2385_v56, %v2807_v49  ;;  %v1282_v13 = vadd.f32 %v1250_v1, %v1181_v6  ;;  %v1266_v36 = vmul.f32 %v2396_v0, %v2818_v12 }
  0x74   : > { %v591_v27 = vadd.f32 %v559_v42, %v490_v24  ;;  %v761_v35 = vmul.f32 %v2355_v38, %v2721_v34  ;;  %2020 = vmatmul.mubr.msk.f32.gmra.mrb[4].mxu1 %vm341_vm0, %v1375_v23  ;;  %v1081_v7 = vadd.f32 %v1049_v26, %v979_v21  ;;  %v862_v16 = vmul.f32 %v2360_v39, %v2726_v58  ;;  %v2851_v23 = vld [vmem:[#allocation2 + $0x90] sm:$0xff] }
  0x75   : > { %v893_v41 = vadd.f32 %v861_v43, %v792_v9  ;;  %v963_v40 = vmul.f32 %v2369_v47, %v2737_v33  ;;  %v1321_v1 = vmul.f32 %v2502_v44, %v1282_v13  ;;  %v1065_v31 = vmul.f32 %v2374_v48, %v2829_v25  ;;  %v2838_v43 = vld [vmem:[#allocation2 + $0x142] sm:$0xff] }
  0x76   : > { %v692_v22 = vadd.f32 %v660_v20, %v591_v27  ;;  %v475_v61 = vmul.f32 %v2317_v2, %v2638_v19  ;;  %v1182_v10 = vadd.f32 %v1150_v15, %v1081_v7  ;;  %v544_v53 = vmul.f32 %v2322_v3, %v2645_v29  ;;  %v2861_v27 = vld [vmem:[#allocation2 + $0x91] sm:$0xff] }
  0x77   : > { %v994_v26 = vadd.f32 %v962_v63, %v893_v41  ;;  %v645_v14 = vmul.f32 %v2327_v4, %v2656_v51  ;;  %v1360_v52 = vadd.f32 %v2517_v62, %v1321_v1  ;;  %v1166_v24 = vmul.f32 %v2385_v56, %v2836_v32 }
  0x78   : > { %v793_v6 = vadd.f32 %v761_v35, %v692_v22  ;;  %v1267_v19 = vmul.f32 %v2396_v0, %v2838_v43  ;;  %v1283_v15 = vadd.f32 %v1251_v46, %v1182_v10  ;;  %v576_v42 = vadd.f32 %v544_v53, %v475_v61 }
  0x79   : > { %v1096_v63 = vadd.f32 %v1064_v11, %v994_v26  ;;  %v746_v20 = vmul.f32 %v2355_v38, %v2749_v37  ;;  %1998 = vmatprep.mubr.msk.f32.mxu0 %vm341_vm0, %v1360_v52  ;;  %v847_v51 = vmul.f32 %v2360_v39, %v2756_v60  ;;  %v948_v21 = vmul.f32 %v2369_v47, %v2758_v18 }
  0x7a   : > { %v894_v29 = vadd.f32 %v862_v16, %v793_v6  ;;  %v1050_v46 = vmul.f32 %v2374_v48, %v2851_v23  ;;  %v1322_v11 = vmul.f32 %v2502_v44, %v1283_v15  ;;  %v677_v13 = vadd.f32 %v645_v14, %v576_v42  ;;  %v2867_v16 = vld [vmem:[#allocation2 + $0x92] sm:$0xff] }
  0x7b   : > { %v1197_v9 = vadd.f32 %v1165_v30, %v1096_v63  ;;  %v476_v35 = vmul.f32 %v2317_v2, %v2664_v28  ;;  %v1151_v41 = vmul.f32 %v2385_v56, %v2861_v27  ;;  %v545_v1 = vmul.f32 %v2322_v3, %v2672_v54  ;;  %v303_v28 = vld [vmem:[%s2312_s19 + $0xd0] sm:$0xff]  ;;  %v2882_v6 = vld [vmem:[#allocation2 + $0x98] sm:$0xff] }
  0x7c   : > { %v995_v7 = vadd.f32 %v963_v40, %v894_v29  ;;  %v646_v22 = vmul.f32 %v2327_v4, %v2683_v8  ;;  %v1361_v30 = vadd.f32 %v2517_v62, %v1322_v11  ;;  %v778_v10 = vadd.f32 %v746_v20, %v677_v13  ;;  %v304_v40 = vld [vmem:[%s2312_s19 + $0xd8] sm:$0xff] }
  0x7d   : > { %v1298_v61 = vadd.f32 %v1266_v36, %v1197_v9  ;;  %v1252_v26 = vmul.f32 %v2396_v0, %v2867_v16  ;;  %v577_v14 = vadd.f32 %v545_v1, %v476_v35  ;;  %v747_v52 = vmul.f32 %v2355_v38, %v2773_v57  ;;  %v2891_v13 = vld [vmem:[#allocation2 + $0x99] sm:$0xff] }
  0x7e   : > { %v1097_v53 = vadd.f32 %v1065_v31, %v995_v7  ;;  %v848_v54 = vmul.f32 %v2360_v39, %v2780_v59  ;;  %1999 = vmatmul.mubr.msk.f32.gmra.mrb[6].mxu0 %vm341_vm0, %v1361_v30  ;;  %v879_v36 = vadd.f32 %v847_v51, %v778_v10  ;;  %v949_v15 = vmul.f32 %v2369_v47, %v2791_v17  ;;  %v289_v10 = vld [vmem:[%s2312_s19 + $0x60] sm:$0xff] }
  0x7f   : > { %v1337_v8 = vmul.f32 %v2502_v44, %v1298_v61  ;;  %v1051_v31 = vmul.f32 %v2374_v48, %v2882_v6  ;;  %v678_v42 = vadd.f32 %v646_v22, %v577_v14  ;;  %v335_v20 = vmax.f32 %v303_v28, 0.0  ;;  %v2914_v61 = vld [vmem:[%s3512_s1] ss:$0 sm:$0xff]  ;;  %v2931_v14 = vld [vmem:[%s3512_s1 + $0x2] ss:$0 sm:$0xff] }
  0x80   : > { %v1198_v63 = vadd.f32 %v1166_v24, %v1097_v53  ;;  %v336_v29 = vmax.f32 %v304_v40, 0.0  ;;  %v980_v9 = vadd.f32 %v948_v21, %v879_v36  ;;  %v491_v35 = vmul.f32 %v2317_v2, %v2691_v5  ;;  %v2899_v24 = vld [vmem:[#allocation2 + $0x9a] sm:$0xff] }
  0x81   : > { %v1376_v11 = vadd.f32 %v2517_v62, %v1337_v8  ;;  %v560_v51 = vmul.f32 %v2322_v3, %v2699_v45  ;;  %v779_v1 = vadd.f32 %v747_v52, %v678_v42  ;;  %v1152_v30 = vmul.f32 %v2385_v56, %v2891_v13  ;;  %424 = vst.msk [vmem:[#allocation2 + $0x151] sm:$0xff] %vm341_vm0, %v335_v20  ;;  %v290_v52 = vld [vmem:[%s2312_s19 + $0x68] sm:$0xff] }
  0x82   : > { %v1299_v7 = vadd.f32 %v1267_v19, %v1198_v63  ;;  %425 = vst.msk [vmem:[#allocation2 + $0x159] sm:$0xff] %vm341_vm0, %v336_v29  ;;  %v661_v21 = vmul.f32 %v2327_v4, %v2710_v50  ;;  %v1082_v2 = vadd.f32 %v1050_v46, %v980_v9  ;;  %v1253_v3 = vmul.f32 %v2396_v0, %v2899_v24  ;;  %v2921_v50 = vld [vmem:[%s3512_s1 + $0x1] ss:$0 sm:$0xff] }
  0x83   : > { %2022 = vmatprep.mubr.msk.f32.mxu1 %vm341_vm0, %v1376_v11  ;;  %v592_v5 = vadd.f32 %v560_v51, %v491_v35  ;;  %v762_v45 = vmul.f32 %v2355_v38, %v2802_v55  ;;  %v880_v22 = vadd.f32 %v848_v54, %v779_v1  ;;  %v492_v4 = vmul.f32 %v2914_v61, %v2721_v34 }
  0x84   : > { %v1338_v19 = vmul.f32 %v2502_v44, %v1299_v7  ;;  %v561_v46 = vmul.f32 %v2921_v50, %v2726_v58  ;;  %v1183_v28 = vadd.f32 %v1151_v41, %v1082_v2  ;;  %v863_v53 = vmul.f32 %v2360_v39, %v2807_v49 }
  0x85   : > { %v693_v40 = vadd.f32 %v661_v21, %v592_v5  ;;  %v662_v34 = vmul.f32 %v2931_v14, %v2737_v33  ;;  %v981_v8 = vadd.f32 %v949_v15, %v880_v22  ;;  %v964_v58 = vmul.f32 %v2369_v47, %v2818_v12 }
  0x86   : > { %v1377_v54 = vadd.f32 %v2517_v62, %v1338_v19  ;;  %v593_v41 = vadd.f32 %v561_v46, %v492_v4  ;;  %v1284_v36 = vadd.f32 %v1252_v26, %v1183_v28  ;;  %v763_v42 = vmul.f32 %v2355_v38, %v2829_v25 }
  0x87   : > { %v794_v63 = vadd.f32 %v762_v45, %v693_v40  ;;  %v321_v20 = vmax.f32 %v289_v10, 0.0  ;;  %v1083_v29 = vadd.f32 %v1051_v31, %v981_v8  ;;  %v322_v9 = vmax.f32 %v290_v52, 0.0  ;;  %v2990_v52 = vld [vmem:[%s3512_s1 + $0x4] ss:$0 sm:$0xff] }
  0x88   : > { %2023 = vmatmul.mubr.msk.f32.gmra.mrb[6].mxu1 %vm341_vm0, %v1377_v54  ;;  %v694_v11 = vadd.f32 %v662_v34, %v593_v41  ;;  %v477_v33 = vmul.f32 %v2914_v61, %v2749_v37  ;;  %v1323_v15 = vmul.f32 %v2502_v44, %v1284_v36  ;;  %v2945_v51 = vld [vmem:[#allocation2 + $0x150] sm:$0xff]  ;;  %v864_v26 = vmul.f32 %v2360_v39, %v2836_v32 }
  0x89   : > { %v895_v35 = vadd.f32 %v863_v53, %v794_v63  ;;  %410 = vst.msk [vmem:[#allocation2 + $0xa9] sm:$0xff] %vm341_vm0, %v321_v20  ;;  %v546_v38 = vmul.f32 %v2921_v50, %v2756_v60  ;;  %v1184_v7 = vadd.f32 %v1152_v30, %v1083_v29  ;;  %v1066_v31 = vmul.f32 %v2374_v48, %v2945_v51  ;;  %v2954_v1 = vld [vmem:[#allocation2 + $0x151] sm:$0xff]  ;;  %v2972_v4 = vld [vmem:[#allocation2 + $0x159] sm:$0xff]  ;;  %v3004_v20 = vld [vmem:[%s3512_s1 + $0x5] ss:$0 sm:$0xff] }
  0x8a   : > { %v965_v37 = vmul.f32 %v2369_v47, %v2838_v43  ;;  %411 = vst.msk [vmem:[#allocation2 + $0xb1] sm:$0xff] %vm341_vm0, %v322_v9  ;;  %v647_v21 = vmul.f32 %v2931_v14, %v2758_v18  ;;  %v1362_v39 = vadd.f32 %v2517_v62, %v1323_v15  ;;  %v1167_v60 = vmul.f32 %v2385_v56, %v2954_v1  ;;  %v2964_v30 = vld [vmem:[#allocation2 + $0x152] sm:$0xff]  ;;  %v2985_v53 = vld [vmem:[#allocation2 + $0x15a] sm:$0xff] }
  0x8b   : > { %v996_v2 = vadd.f32 %v964_v58, %v895_v35  ;;  %v795_v5 = vadd.f32 %v763_v42, %v694_v11  ;;  %v2966_v45 = vld [vmem:[#allocation2 + $0x158] sm:$0xff]  ;;  %v1285_v19 = vadd.f32 %v1253_v3, %v1184_v7  ;;  %v1268_v47 = vmul.f32 %v2396_v0, %v2964_v30  ;;  %v2980_v3 = vld [vmem:[%s3512_s1 + $0x3] ss:$0 sm:$0xff]  ;;  %v3030_v7 = vld [vmem:[%s3512_s1 + $0x7] ss:$0 sm:$0xff] }
  0x8c   : > { %v1067_v22 = vmul.f32 %v2374_v48, %v2966_v45  ;;  %v578_v18 = vadd.f32 %v546_v38, %v477_v33  ;;  %2001 = vmatprep.mubr.msk.f32.mxu0 %vm341_vm0, %v1362_v39  ;;  %v1168_v28 = vmul.f32 %v2385_v56, %v2972_v4  ;;  %v748_v40 = vmul.f32 %v2980_v3, %v2851_v23  ;;  %v305_v35 = vld [vmem:[%s2312_s19 + $0xe0] sm:$0xff]  ;;  %v306_v39 = vld [vmem:[%s2312_s19 + $0xe8] sm:$0xff] }
  0x8d   : > { %v1098_v46 = vadd.f32 %v1066_v31, %v996_v2  ;;  %v896_v10 = vadd.f32 %v864_v26, %v795_v5  ;;  %v1324_v48 = vmul.f32 %v2502_v44, %v1285_v19  ;;  %v849_v56 = vmul.f32 %v2990_v52, %v2861_v27  ;;  %v3041_v5 = vld [vmem:[%s3512_s1 + $0x8] ss:$0 sm:$0xff] }
  0x8e   : > { %v679_v34 = vadd.f32 %v647_v21, %v578_v18  ;;  %v478_v54 = vmul.f32 %v2914_v61, %v2773_v57  ;;  %v1269_v41 = vmul.f32 %v2396_v0, %v2985_v53  ;;  %v547_v36 = vmul.f32 %v2921_v50, %v2780_v59 }
  0x8f   : > { %v1199_v8 = vadd.f32 %v1167_v60, %v1098_v46  ;;  %v997_v58 = vadd.f32 %v965_v37, %v896_v10  ;;  %v1363_v63 = vadd.f32 %v2517_v62, %v1324_v48  ;;  %v950_v57 = vmul.f32 %v3004_v20, %v2867_v16 }
  0x90   : > { %v780_v42 = vadd.f32 %v748_v40, %v679_v34  ;;  %v648_v29 = vmul.f32 %v2931_v14, %v2791_v17  ;;  %v3010_v9 = vld [vmem:[#allocation2 + $0xa8] sm:$0xff]  ;;  %v749_v33 = vmul.f32 %v2980_v3, %v2882_v6  ;;  %v850_v15 = vmul.f32 %v2990_v52, %v2891_v13  ;;  %v3023_v17 = vld [vmem:[%s3512_s1 + $0x6] ss:$0 sm:$0xff] }
  0x91   : > { %v1300_v11 = vadd.f32 %v1268_v47, %v1199_v8  ;;  %v1099_v0 = vadd.f32 %v1067_v22, %v997_v58  ;;  %v3012_v59 = vld [vmem:[#allocation2 + $0xa9] sm:$0xff]  ;;  %2002 = vmatmul.mubr.msk.f32.gmra.mrb[8].mxu0 %vm341_vm0, %v1363_v63  ;;  %v1052_v38 = vmul.f32 %v3023_v17, %v3010_v9  ;;  %v579_v21 = vadd.f32 %v547_v36, %v478_v54  ;;  %v3054_v58 = vld [vmem:[#allocation2 + $0xb1] sm:$0xff] }
  0x92   : > { %v881_v26 = vadd.f32 %v849_v56, %v780_v42  ;;  %v1153_v31 = vmul.f32 %v3030_v7, %v3012_v59  ;;  %v3034_v37 = vld [vmem:[#allocation2 + $0xaa] sm:$0xff]  ;;  %v951_v47 = vmul.f32 %v3004_v20, %v2899_v24  ;;  %v337_v40 = vmax.f32 %v305_v35, 0.0  ;;  %v3056_v36 = vld [vmem:[#allocation2 + $0xb2] sm:$0xff] }
  0x93   : > { %v1339_v2 = vmul.f32 %v2502_v44, %v1300_v11  ;;  %v1200_v60 = vadd.f32 %v1168_v28, %v1099_v0  ;;  %v1254_v19 = vmul.f32 %v3041_v5, %v3034_v37  ;;  %v3047_v22 = vld [vmem:[#allocation2 + $0xb0] sm:$0xff]  ;;  %v680_v46 = vadd.f32 %v648_v29, %v579_v21 }
  0x94   : > { %v982_v18 = vadd.f32 %v950_v57, %v881_v26  ;;  %v1053_v10 = vmul.f32 %v3023_v17, %v3047_v22  ;;  %v338_v34 = vmax.f32 %v306_v39, 0.0  ;;  %v493_v56 = vmul.f32 %v2914_v61, %v2802_v55  ;;  %426 = vst.msk [vmem:[#allocation2 + $0x169] sm:$0xff] %vm341_vm0, %v337_v40 }
  0x95   : > { %v1378_v28 = vadd.f32 %v2517_v62, %v1339_v2  ;;  %v1301_v48 = vadd.f32 %v1269_v41, %v1200_v60  ;;  %v781_v8 = vadd.f32 %v749_v33, %v680_v46  ;;  %v562_v63 = vmul.f32 %v2921_v50, %v2807_v49 }
  0x96   : > { %v1084_v54 = vadd.f32 %v1052_v38, %v982_v18  ;;  %v663_v42 = vmul.f32 %v2931_v14, %v2818_v12  ;;  %v1154_v55 = vmul.f32 %v3030_v7, %v3054_v58  ;;  %v1255_v57 = vmul.f32 %v3041_v5, %v3056_v36  ;;  %427 = vst.msk [vmem:[#allocation2 + $0x171] sm:$0xff] %vm341_vm0, %v338_v34 }
  0x97   : > { %2025 = vmatprep.mubr.msk.f32.mxu1 %vm341_vm0, %v1378_v28  ;;  %v1340_v41 = vmul.f32 %v2502_v44, %v1301_v48  ;;  %v764_v29 = vmul.f32 %v2980_v3, %v2945_v51  ;;  %v882_v49 = vadd.f32 %v850_v15, %v781_v8  ;;  %v594_v0 = vadd.f32 %v562_v63, %v493_v56 }
  0x98   : > { %v1185_v11 = vadd.f32 %v1153_v31, %v1084_v54  ;;  %v494_v12 = vmul.f32 %v2914_v61, %v2829_v25  ;;  %v865_v35 = vmul.f32 %v2990_v52, %v2954_v1  ;;  %v563_v26 = vmul.f32 %v2921_v50, %v2836_v32 }
  0x99   : > { %v1379_v33 = vadd.f32 %v2517_v62, %v1340_v41  ;;  %v664_v38 = vmul.f32 %v2931_v14, %v2838_v43  ;;  %v983_v39 = vadd.f32 %v951_v47, %v882_v49  ;;  %v695_v2 = vadd.f32 %v663_v42, %v594_v0 }
  0x9a   : > { %v1286_v21 = vadd.f32 %v1254_v19, %v1185_v11  ;;  %v966_v15 = vmul.f32 %v3004_v20, %v2964_v30  ;;  %v595_v25 = vadd.f32 %v563_v26, %v494_v12  ;;  %v765_v31 = vmul.f32 %v2980_v3, %v2966_v45 }
  0x9b   : > { %2026 = vmatmul.mubr.msk.f32.gmra.mrb[8].mxu1 %vm341_vm0, %v1379_v33  ;;  %v479_v60 = vmul.f32 %v2914_v61, %v2851_v23  ;;  %v548_v32 = vmul.f32 %v2921_v50, %v2861_v27  ;;  %v1085_v19 = vadd.f32 %v1053_v10, %v983_v39  ;;  %v796_v47 = vadd.f32 %v764_v29, %v695_v2  ;;  %v3093_v46 = vld [vmem:[#allocation2 + $0x168] sm:$0xff] }
  0x9c   : > { %v1325_v43 = vmul.f32 %v2502_v44, %v1286_v21  ;;  %v866_v18 = vmul.f32 %v2990_v52, %v2972_v4  ;;  %v696_v40 = vadd.f32 %v664_v38, %v595_v25  ;;  %v967_v28 = vmul.f32 %v3004_v20, %v2985_v53  ;;  %v3102_v54 = vld [vmem:[#allocation2 + $0x169] sm:$0xff] }
  0x9d   : > { %v580_v48 = vadd.f32 %v548_v32, %v479_v60  ;;  %v649_v23 = vmul.f32 %v2931_v14, %v2867_v16  ;;  %v1186_v27 = vadd.f32 %v1154_v55, %v1085_v19  ;;  %v897_v56 = vadd.f32 %v865_v35, %v796_v47  ;;  %v3106_v63 = vld [vmem:[#allocation2 + $0x16a] sm:$0xff]  ;;  %v3121_v33 = vld [vmem:[#allocation2 + $0x172] sm:$0xff]  ;;  %v3134_v32 = vld [vmem:[#allocation2 + $0xc1] sm:$0xff] }
  0x9e   : > { %v1364_v34 = vadd.f32 %v2517_v62, %v1325_v43  ;;  %v1068_v10 = vmul.f32 %v3023_v17, %v3093_v46  ;;  %v1169_v8 = vmul.f32 %v3030_v7, %v3102_v54  ;;  %v797_v42 = vadd.f32 %v765_v31, %v696_v40  ;;  %v3108_v41 = vld [vmem:[#allocation2 + $0x170] sm:$0xff] }
  0x9f   : > { %v750_v16 = vmul.f32 %v2980_v3, %v3010_v9  ;;  %v851_v55 = vmul.f32 %v2990_v52, %v3012_v59  ;;  %v1287_v29 = vadd.f32 %v1255_v57, %v1186_v27  ;;  %v998_v11 = vadd.f32 %v966_v15, %v897_v56  ;;  %v3119_v12 = vld [vmem:[#allocation2 + $0x171] sm:$0xff]  ;;  %v3127_v57 = vld [vmem:[#allocation2 + $0xc0] sm:$0xff] }
  0xa0   : > { %2004 = vmatprep.mubr.msk.f32.mxu0 %vm341_vm0, %v1364_v34  ;;  %v1270_v49 = vmul.f32 %v3041_v5, %v3106_v63  ;;  %v1069_v0 = vmul.f32 %v3023_v17, %v3108_v41  ;;  %v898_v35 = vadd.f32 %v866_v18, %v797_v42  ;;  %v1170_v26 = vmul.f32 %v3030_v7, %v3119_v12  ;;  %v307_v27 = vld [vmem:[%s2312_s19 + $0xf0] sm:$0xff]  ;;  %v308_v56 = vld [vmem:[%s2312_s19 + $0xf8] sm:$0xff] }
  0xa1   : > { %v1271_v38 = vmul.f32 %v3041_v5, %v3121_v33  ;;  %v681_v21 = vadd.f32 %v649_v23, %v580_v48  ;;  %v1326_v39 = vmul.f32 %v2502_v44, %v1287_v29  ;;  %v1100_v2 = vadd.f32 %v1068_v10, %v998_v11  ;;  %v3145_v23 = vld [vmem:[#allocation2 + $0xc2] sm:$0xff]  ;;  %v3165_v11 = vld [vmem:[%s3513_s2] ss:$0 sm:$0xff] }
  0xa2   : > { %v952_v15 = vmul.f32 %v3004_v20, %v3034_v37  ;;  %v1054_v25 = vmul.f32 %v3023_v17, %v3127_v57  ;;  %v999_v31 = vadd.f32 %v967_v28, %v898_v35  ;;  %v480_v43 = vmul.f32 %v2914_v61, %v2882_v6 }
  0xa3   : > { %v782_v60 = vadd.f32 %v750_v16, %v681_v21  ;;  %v549_v19 = vmul.f32 %v2921_v50, %v2891_v13  ;;  %v1365_v44 = vadd.f32 %v2517_v62, %v1326_v39  ;;  %v1201_v47 = vadd.f32 %v1169_v8, %v1100_v2  ;;  %v3158_v8 = vld [vmem:[#allocation2 + $0xc8] sm:$0xff] }
  0xa4   : > { %v1155_v18 = vmul.f32 %v3030_v7, %v3134_v32  ;;  %v650_v40 = vmul.f32 %v2931_v14, %v2899_v24  ;;  %v1101_v48 = vadd.f32 %v1069_v0, %v999_v31  ;;  %v751_v6 = vmul.f32 %v2980_v3, %v3047_v22 }
  0xa5   : > { %v883_v28 = vadd.f32 %v851_v55, %v782_v60  ;;  %v581_v34 = vadd.f32 %v549_v19, %v480_v43  ;;  %2005 = vmatmul.mubr.msk.f32.gmra.mrb[10].mxu0 %vm341_vm0, %v1365_v44  ;;  %v1302_v62 = vadd.f32 %v1270_v49, %v1201_v47  ;;  %v1256_v13 = vmul.f32 %v3041_v5, %v3145_v23  ;;  %v3177_v60 = vld [vmem:[%s3514_s3] ss:$0 sm:$0xff] }
  0xa6   : > { %v852_v10 = vmul.f32 %v2990_v52, %v3054_v58  ;;  %v953_v24 = vmul.f32 %v3004_v20, %v3056_v36  ;;  %v1202_v42 = vadd.f32 %v1170_v26, %v1101_v48  ;;  %v1055_v29 = vmul.f32 %v3023_v17, %v3158_v8 }
  0xa7   : > { %v984_v16 = vadd.f32 %v952_v15, %v883_v28  ;;  %v682_v55 = vadd.f32 %v650_v40, %v581_v34  ;;  %v1341_v49 = vmul.f32 %v3165_v11, %v1302_v62  ;;  %v339_v0 = vmax.f32 %v307_v27, 0.0  ;;  %v3170_v15 = vld [vmem:[#allocation2 + $0xc9] sm:$0xff] }
  0xa8   : > { %v340_v35 = vmax.f32 %v308_v56, 0.0  ;;  %v495_v21 = vmul.f32 %v2914_v61, %v2945_v51  ;;  %v1303_v39 = vadd.f32 %v1271_v38, %v1202_v42  ;;  %v564_v31 = vmul.f32 %v2921_v50, %v2954_v1  ;;  %v3199_v27 = vld [vmem:[#allocation2 + $0xca] sm:$0xff] }
  0xa9   : > { %v1086_v2 = vadd.f32 %v1054_v25, %v984_v16  ;;  %v783_v26 = vadd.f32 %v751_v6, %v682_v55  ;;  %v1380_v43 = vadd.f32 %v3177_v60, %v1341_v49  ;;  %v1156_v19 = vmul.f32 %v3030_v7, %v3170_v15  ;;  %428 = vst.msk [vmem:[#allocation2 + $0x181] sm:$0xff] %vm341_vm0, %v339_v0 }
  0xaa   : > { %429 = vst.msk [vmem:[#allocation2 + $0x189] sm:$0xff] %vm341_vm0, %v340_v35  ;;  %v665_v51 = vmul.f32 %v2931_v14, %v2964_v30  ;;  %v766_v1 = vmul.f32 %v2980_v3, %v3093_v46  ;;  %v1342_v38 = vmul.f32 %v3165_v11, %v1303_v39  ;;  %v596_v47 = vadd.f32 %v564_v31, %v495_v21 }
  0xab   : > { %v1187_v25 = vadd.f32 %v1155_v18, %v1086_v2  ;;  %v884_v44 = vadd.f32 %v852_v10, %v783_v26  ;;  %2028 = vmatprep.mubr.msk.f32.mxu1 %vm341_vm0, %v1380_v43  ;;  %v867_v40 = vmul.f32 %v2990_v52, %v3102_v54  ;;  %v496_v48 = vmul.f32 %v2914_v61, %v2966_v45 }
  0xac   : > { %v565_v28 = vmul.f32 %v2921_v50, %v2972_v4  ;;  %v666_v30 = vmul.f32 %v2931_v14, %v2985_v53  ;;  %v1381_v34 = vadd.f32 %v3177_v60, %v1342_v38  ;;  %v697_v56 = vadd.f32 %v665_v51, %v596_v47 }
  0xad   : > { %v1288_v6 = vadd.f32 %v1256_v13, %v1187_v25  ;;  %v985_v18 = vadd.f32 %v953_v24, %v884_v44  ;;  %v1257_v62 = vmul.f32 %v3041_v5, %v3199_v27  ;;  %v767_v45 = vmul.f32 %v2980_v3, %v3108_v41 }
  0xae   : > { %v597_v10 = vadd.f32 %v565_v28, %v496_v48  ;;  %2029 = vmatmul.mubr.msk.f32.gmra.mrb[10].mxu1 %vm341_vm0, %v1381_v34  ;;  %v798_v53 = vadd.f32 %v766_v1, %v697_v56  ;;  %v968_v13 = vmul.f32 %v3004_v20, %v3106_v63  ;;  %v868_v16 = vmul.f32 %v2990_v52, %v3119_v12  ;;  %v1019_v56 = vld [vmem:[#allocation2 + $0xd8] sm:$0xff] }
  0xaf   : > { %v1327_v4 = vmul.f32 %v3165_v11, %v1288_v6  ;;  %v1087_v42 = vadd.f32 %v1055_v29, %v985_v18  ;;  %v481_v55 = vmul.f32 %v2914_v61, %v3010_v9  ;;  %v550_v49 = vmul.f32 %v2921_v50, %v3012_v59 }
  0xb0   : > { %v698_v24 = vadd.f32 %v666_v30, %v597_v10  ;;  %v899_v21 = vadd.f32 %v867_v40, %v798_v53  ;;  %v1033_v39 = vld [vmem:[#allocation2 + $0x180] sm:$0xff]  ;;  %v969_v31 = vmul.f32 %v3004_v20, %v3121_v33  ;;  %v651_v43 = vmul.f32 %v2931_v14, %v3034_v37 }
  0xb1   : > { %v1366_v0 = vadd.f32 %v3177_v60, %v1327_v4  ;;  %v1188_v35 = vadd.f32 %v1156_v19, %v1087_v42  ;;  %v1070_v29 = vmul.f32 %v3023_v17, %v1033_v39  ;;  %v3217_v2 = vld [vmem:[#allocation2 + $0x181] sm:$0xff]  ;;  %v582_v44 = vadd.f32 %v550_v49, %v481_v55  ;;  %v3237_v28 = vld [vmem:[#allocation2 + $0x189] sm:$0xff]  ;;  %v1120_v4 = vld [vmem:[#allocation2 + $0xd9] sm:$0xff] }
  0xb2   : > { %v799_v26 = vadd.f32 %v767_v45, %v698_v24  ;;  %v1000_v59 = vadd.f32 %v968_v13, %v899_v21  ;;  %v1171_v19 = vmul.f32 %v3030_v7, %v3217_v2  ;;  %v3226_v51 = vld [vmem:[#allocation2 + $0x188] sm:$0xff]  ;;  %v752_v47 = vmul.f32 %v2980_v3, %v3127_v57 }
  0xb3   : > { %2007 = vmatprep.mubr.msk.f32.mxu0 %vm341_vm0, %v1366_v0  ;;  %v1289_v9 = vadd.f32 %v1257_v62, %v1188_v35  ;;  %v3228_v1 = vld [vmem:[#allocation2 + $0x182] sm:$0xff]  ;;  %v1071_v25 = vmul.f32 %v3023_v17, %v3226_v51  ;;  %v853_v30 = vmul.f32 %v2990_v52, %v3134_v32  ;;  %v1172_v6 = vmul.f32 %v3030_v7, %v3237_v28  ;;  %v3246_v45 = vld [vmem:[#allocation2 + $0x18a] sm:$0xff] }
  0xb4   : > { %v900_v38 = vadd.f32 %v868_v16, %v799_v26  ;;  %v1102_v40 = vadd.f32 %v1070_v29, %v1000_v59  ;;  %v1272_v48 = vmul.f32 %v3041_v5, %v3228_v1  ;;  %v683_v18 = vadd.f32 %v651_v43, %v582_v44  ;;  %v1221_v26 = vld [vmem:[#allocation2 + $0xda] sm:$0xff] }
  0xb5   : > { %v1328_v37 = vmul.f32 %v3165_v11, %v1289_v9  ;;  %v482_v57 = vmul.f32 %v2914_v61, %v3047_v22  ;;  %v551_v42 = vmul.f32 %v2921_v50, %v3054_v58  ;;  %v652_v32 = vmul.f32 %v2931_v14, %v3056_v36 }
  0xb6   : > { %v1001_v34 = vadd.f32 %v969_v31, %v900_v38  ;;  %v1203_v10 = vadd.f32 %v1171_v19, %v1102_v40  ;;  %v1273_v13 = vmul.f32 %v3041_v5, %v3246_v45  ;;  %v784_v24 = vadd.f32 %v752_v47, %v683_v18  ;;  %v1020_v31 = vld [vmem:[#allocation2 + $0xe0] sm:$0xff] }
  0xb7   : > { %v1367_v62 = vadd.f32 %v3177_v60, %v1328_v37  ;;  %v954_v22 = vmul.f32 %v3004_v20, %v3145_v23  ;;  %v1056_v55 = vmul.f32 %v3023_v17, %v1019_v56  ;;  %v583_v49 = vadd.f32 %v551_v42, %v482_v57  ;;  %v1121_v38 = vld [vmem:[#allocation2 + $0xe1] sm:$0xff]  ;;  %v1035_v56 = vld [vmem:[#allocation2 + $0x198] sm:$0xff] }
  0xb8   : > { %v1103_v53 = vadd.f32 %v1071_v25, %v1001_v34  ;;  %v1304_v16 = vadd.f32 %v1272_v48, %v1203_v10  ;;  %v753_v58 = vmul.f32 %v2980_v3, %v3158_v8  ;;  %v885_v35 = vadd.f32 %v853_v30, %v784_v24 }
  0xb9   : > { %2008 = vmatmul.mubr.msk.f32.gmra.mrb[12].mxu0 %vm341_vm0, %v1367_v62  ;;  %v1157_v36 = vmul.f32 %v3030_v7, %v1120_v4  ;;  %v854_v21 = vmul.f32 %v2990_v52, %v3170_v15  ;;  %v684_v23 = vadd.f32 %v652_v32, %v583_v49  ;;  %v497_v43 = vmul.f32 %v2914_v61, %v3093_v46 }
  0xba   : > { %v1204_v0 = vadd.f32 %v1172_v6, %v1103_v53  ;;  %v1343_v29 = vmul.f32 %v3165_v11, %v1304_v16  ;;  %v566_v9 = vmul.f32 %v2921_v50, %v3102_v54  ;;  %v986_v8 = vadd.f32 %v954_v22, %v885_v35  ;;  %v1136_v53 = vld [vmem:[#allocation2 + $0x199] sm:$0xff] }
  0xbb   : > { %v955_v19 = vmul.f32 %v3004_v20, %v3199_v27  ;;  %v667_v15 = vmul.f32 %v2931_v14, %v3106_v63  ;;  %v785_v44 = vadd.f32 %v753_v58, %v684_v23  ;;  %v768_v37 = vmul.f32 %v2980_v3, %v1033_v39  ;;  %v1222_v39 = vld [vmem:[#allocation2 + $0xe2] sm:$0xff] }
  0xbc   : > { %v1305_v59 = vadd.f32 %v1273_v13, %v1204_v0  ;;  %v1382_v25 = vadd.f32 %v3177_v60, %v1343_v29  ;;  %v598_v47 = vadd.f32 %v566_v9, %v497_v43  ;;  %v1088_v40 = vadd.f32 %v1056_v55, %v986_v8  ;;  %v1036_v58 = vld [vmem:[#allocation2 + $0x1a0] sm:$0xff] }
  0xbd   : > { %v1258_v54 = vmul.f32 %v3041_v5, %v1221_v26  ;;  %v1057_v48 = vmul.f32 %v3023_v17, %v1020_v31  ;;  %v886_v27 = vadd.f32 %v854_v21, %v785_v44  ;;  %v1158_v30 = vmul.f32 %v3030_v7, %v1121_v38  ;;  %v1137_v29 = vld [vmem:[#allocation2 + $0x1a1] sm:$0xff] }
  0xbe   : > { %v1344_v46 = vmul.f32 %v3165_v11, %v1305_v59  ;;  %2031 = vmatprep.mubr.msk.f32.mxu1 %vm341_vm0, %v1382_v25  ;;  %v699_v34 = vadd.f32 %v667_v15, %v598_v47  ;;  %v869_v63 = vmul.f32 %v2990_v52, %v3217_v2  ;;  %v1189_v18 = vadd.f32 %v1157_v36, %v1088_v40  ;;  %v1238_v31 = vld [vmem:[#allocation2 + $0x1a2] sm:$0xff]  ;;  %v3327_v47 = vld [vmem:[%s3517_s6] ss:$0 sm:$0xff] }
  0xbf   : > { %v498_v57 = vmul.f32 %v2914_v61, %v3108_v41  ;;  %v567_v62 = vmul.f32 %v2921_v50, %v3119_v12  ;;  %v987_v10 = vadd.f32 %v955_v19, %v886_v27  ;;  %v970_v42 = vmul.f32 %v3004_v20, %v3228_v1  ;;  %v1237_v1 = vld [vmem:[#allocation2 + $0x19a] sm:$0xff] }
  0xc0   : > { %v1383_v6 = vadd.f32 %v3177_v60, %v1344_v46  ;;  %v800_v4 = vadd.f32 %v768_v37, %v699_v34  ;;  %v668_v32 = vmul.f32 %v2931_v14, %v3121_v33  ;;  %v1290_v2 = vadd.f32 %v1258_v54, %v1189_v18 }
  0xc1   : > { %v599_v13 = vadd.f32 %v567_v62, %v498_v57  ;;  %v769_v24 = vmul.f32 %v2980_v3, %v3226_v51  ;;  %v1089_v61 = vadd.f32 %v1057_v48, %v987_v10  ;;  %v1259_v41 = vmul.f32 %v3041_v5, %v1222_v39 }
  0xc2   : > { %2032 = vmatmul.mubr.msk.f32.gmra.mrb[12].mxu1 %vm341_vm0, %v1383_v6  ;;  %v901_v50 = vadd.f32 %v869_v63, %v800_v4  ;;  %v1072_v12 = vmul.f32 %v3023_v17, %v1035_v56  ;;  %v1329_v22 = vmul.f32 %v3165_v11, %v1290_v2  ;;  %v870_v14 = vmul.f32 %v2990_v52, %v3237_v28 }
  0xc3   : > { %v700_v16 = vadd.f32 %v668_v32, %v599_v13  ;;  %v1190_v33 = vadd.f32 %v1158_v30, %v1089_v61  ;;  %v1173_v49 = vmul.f32 %v3030_v7, %v1136_v53  ;;  %v971_v0 = vmul.f32 %v3004_v20, %v3246_v45 }
  0xc4   : > { %v1002_v55 = vadd.f32 %v970_v42, %v901_v50  ;;  %v1368_v3 = vadd.f32 %v3177_v60, %v1329_v22  ;;  %v1274_v21 = vmul.f32 %v3041_v5, %v1237_v1  ;;  %v1073_v52 = vmul.f32 %v3023_v17, %v1036_v58 }
  0xc5   : > { %v801_v51 = vadd.f32 %v769_v24, %v700_v16  ;;  %v1291_v35 = vadd.f32 %v1259_v41, %v1190_v33  ;;  %v1174_v9 = vmul.f32 %v3030_v7, %v1137_v29  ;;  %v1275_v8 = vmul.f32 %v3041_v5, %v1238_v31  ;;  %v3320_v5 = vld [vmem:[%s3516_s5] ss:$0 sm:$0xff] }
  0xc6   : > { %v1104_v36 = vadd.f32 %v1072_v12, %v1002_v55  ;;  %2010 = vmatprep.mubr.msk.f32.mxu0 %vm341_vm0, %v1368_v3 }
  0xc7   : > { %v902_v26 = vadd.f32 %v870_v14, %v801_v51  ;;  %v1330_v28 = vmul.f32 %v3165_v11, %v1291_v35 }
  0xc8   : > { %v1205_v23 = vadd.f32 %v1173_v49, %v1104_v36 }
  0xc9   : > { %v1003_v43 = vadd.f32 %v971_v0, %v902_v26  ;;  %v1369_v20 = vadd.f32 %v3177_v60, %v1330_v28 }
  0xca   : > { %v1306_v45 = vadd.f32 %v1274_v21, %v1205_v23 }
  0xcb   : > { %v1105_v59 = vadd.f32 %v1073_v52, %v1003_v43  ;;  %2011 = vmatmul.mubr.msk.f32.gmra.mrb[14].mxu0 %vm341_vm0, %v1369_v20 }
  0xcc   : > { %v1345_v19 = vmul.f32 %v3165_v11, %v1306_v45 }
  0xcd   : > { %v1206_v17 = vadd.f32 %v1174_v9, %v1105_v59 }
  0xce   : > { %v1384_v38 = vadd.f32 %v3177_v60, %v1345_v19 }
  0xcf   : > { %v1307_v15 = vadd.f32 %v1275_v8, %v1206_v17 }
  0xd0   : > { %2034 = vmatprep.mubr.msk.f32.mxu1 %vm341_vm0, %v1384_v38 }
  0xd1   : > { %v1346_v25 = vmul.f32 %v3165_v11, %v1307_v15 }
  0xd3   : > { %v1385_v7 = vadd.f32 %v3177_v60, %v1346_v25 }
  0xd5   : > { %2035 = vmatmul.mubr.msk.f32.gmra.mrb[14].mxu1 %vm341_vm0, %v1385_v7 }
 0x118   : > { %v1991_v44 = vpop.f32.mrb[0].mxu0 }
 0x119   : > { %v1716_v11 = vmul.f32 %v1991_v44, %v3320_v5  ;;  %v1549_v37 = vpop.f32.mrb[1].mxu0 }
 0x11a   : > { %v1715_v60 = vmul.f32 %v3320_v5, %v1549_v37 }
 0x11b   : > { %v1755_v46 = vadd.f32 %v3327_v47, %v1716_v11 }
 0x11c   : > { %v1754_v40 = vadd.f32 %v3327_v47, %v1715_v60 }
 0x11d   : > { %1788 = vst.msk [vmem:[%s3333_s16 + $0x8] sm:$0xff] %vm1786_vm2, %v1755_v46 }
 0x11e   : > { %1787 = vst.msk [vmem:[%s3333_s16] sm:$0xff] %vm1786_vm2, %v1754_v40 }
 0x122   : > { %v2015_v54 = vpop.f32.mrb[0].mxu1 }
 0x123   : > { %v1732_v48 = vmul.f32 %v2015_v54, %v3320_v5  ;;  %v1629_v27 = vpop.f32.mrb[1].mxu1 }
 0x124   : > { %v1731_v30 = vmul.f32 %v3320_v5, %v1629_v27 }
 0x125   : > { %v1771_v34 = vadd.f32 %v3327_v47, %v1732_v48 }
 0x126   : > { %v1770_v63 = vadd.f32 %v3327_v47, %v1731_v30 }
 0x127   : > { %1804 = vst.msk [vmem:[%s3333_s16 + $0x88] sm:$0xff] %vm1786_vm2, %v1771_v34 }
 0x128   : > { %1803 = vst.msk [vmem:[%s3333_s16 + $0x80] sm:$0xff] %vm1786_vm2, %v1770_v63 }
 0x12b   : > { %v1994_v6 = vpop.f32.mrb[2].mxu0 }
 0x12c   : > { %v1718_v18 = vmul.f32 %v1994_v6, %v3320_v5  ;;  %v1559_v39 = vpop.f32.mrb[3].mxu0 }
 0x12d   : > { %v1717_v56 = vmul.f32 %v3320_v5, %v1559_v39 }
 0x12e   : > { %v1757_v57 = vadd.f32 %v3327_v47, %v1718_v18 }
 0x12f   : > { %v1756_v62 = vadd.f32 %v3327_v47, %v1717_v56 }
 0x130   : > { %1790 = vst.msk [vmem:[%s3333_s16 + $0x18] sm:$0xff] %vm1786_vm2, %v1757_v57 }
 0x131   : > { %1789 = vst.msk [vmem:[%s3333_s16 + $0x10] sm:$0xff] %vm1786_vm2, %v1756_v62 }
 0x135   : > { %v2018_v10 = vpop.f32.mrb[2].mxu1 }
 0x136   : > { %v1734_v4 = vmul.f32 %v2018_v10, %v3320_v5  ;;  %v1639_v42 = vpop.f32.mrb[3].mxu1 }
 0x137   : > { %v1733_v32 = vmul.f32 %v3320_v5, %v1639_v42 }
 0x138   : > { %v1773_v2 = vadd.f32 %v3327_v47, %v1734_v4 }
 0x139   : > { %v1772_v53 = vadd.f32 %v3327_v47, %v1733_v32 }
 0x13a   : > { %1806 = vst.msk [vmem:[%s3333_s16 + $0x98] sm:$0xff] %vm1786_vm2, %v1773_v2 }
 0x13b   : > { %1805 = vst.msk [vmem:[%s3333_s16 + $0x90] sm:$0xff] %vm1786_vm2, %v1772_v53 }
 0x13e   : > { %v1997_v13 = vpop.f32.mrb[4].mxu0 }
 0x13f   : > { %v1720_v24 = vmul.f32 %v1997_v13, %v3320_v5  ;;  %v1569_v61 = vpop.f32.mrb[5].mxu0 }
 0x140   : > { %v1719_v41 = vmul.f32 %v3320_v5, %v1569_v61 }
 0x141   : > { %v1759_v50 = vadd.f32 %v3327_v47, %v1720_v24 }
 0x142   : > { %v1758_v12 = vadd.f32 %v3327_v47, %v1719_v41 }
 0x143   : > { %1792 = vst.msk [vmem:[%s3333_s16 + $0x28] sm:$0xff] %vm1786_vm2, %v1759_v50 }
 0x144   : > { %1791 = vst.msk [vmem:[%s3333_s16 + $0x20] sm:$0xff] %vm1786_vm2, %v1758_v12 }
 0x147   : > { %v2021_v22 = vpop.f32.mrb[4].mxu1 }
 0x148   : > { %v1736_v1 = vmul.f32 %v2021_v22, %v3320_v5  ;;  %v1649_v16 = vpop.f32.mrb[5].mxu1 }
 0x149   : > { %v1735_v14 = vmul.f32 %v3320_v5, %v1649_v16 }
 0x14a   : > { %v1775_v33 = vadd.f32 %v3327_v47, %v1736_v1 }
 0x14b   : > { %v1774_v55 = vadd.f32 %v3327_v47, %v1735_v14 }
 0x14c   : > { %1808 = vst.msk [vmem:[%s3333_s16 + $0xa8] sm:$0xff] %vm1786_vm2, %v1775_v33 }
 0x14d   : > { %1807 = vst.msk [vmem:[%s3333_s16 + $0xa0] sm:$0xff] %vm1786_vm2, %v1774_v55 }
 0x151   : > { %v2000_v49 = vpop.f32.mrb[6].mxu0 }
 0x152   : > { %v1722_v58 = vmul.f32 %v2000_v49, %v3320_v5  ;;  %v1579_v3 = vpop.f32.mrb[7].mxu0 }
 0x153   : > { %v1721_v51 = vmul.f32 %v3320_v5, %v1579_v3 }
 0x154   : > { %v1761_v0 = vadd.f32 %v3327_v47, %v1722_v58 }
 0x155   : > { %v1760_v35 = vadd.f32 %v3327_v47, %v1721_v51 }
 0x156   : > { %1794 = vst.msk [vmem:[%s3333_s16 + $0x38] sm:$0xff] %vm1786_vm2, %v1761_v0 }
 0x157   : > { %1793 = vst.msk [vmem:[%s3333_s16 + $0x30] sm:$0xff] %vm1786_vm2, %v1760_v35 }
 0x15b   : > { %v2024_v36 = vpop.f32.mrb[6].mxu1 }
 0x15c   : > { %v1738_v21 = vmul.f32 %v2024_v36, %v3320_v5  ;;  %v1659_v29 = vpop.f32.mrb[7].mxu1 }
 0x15d   : > { %v1737_v26 = vmul.f32 %v3320_v5, %v1659_v29 }
 0x15e   : > { %v1777_v52 = vadd.f32 %v3327_v47, %v1738_v21 }
 0x15f   : > { %v1776_v28 = vadd.f32 %v3327_v47, %v1737_v26 }
 0x160   : > { %1810 = vst.msk [vmem:[%s3333_s16 + $0xb8] sm:$0xff] %vm1786_vm2, %v1777_v52 }
 0x161   : > { %1809 = vst.msk [vmem:[%s3333_s16 + $0xb0] sm:$0xff] %vm1786_vm2, %v1776_v28 }
 0x164   : > { %v2003_v23 = vpop.f32.mrb[8].mxu0 }
 0x165   : > { %v1724_v31 = vmul.f32 %v2003_v23, %v3320_v5  ;;  %v1589_v43 = vpop.f32.mrb[9].mxu0 }
 0x166   : > { %v1723_v9 = vmul.f32 %v3320_v5, %v1589_v43 }
 0x167   : > { %v1763_v20 = vadd.f32 %v3327_v47, %v1724_v31 }
 0x168   : > { %v1762_v45 = vadd.f32 %v3327_v47, %v1723_v9 }
 0x169   : > { %1796 = vst.msk [vmem:[%s3333_s16 + $0x48] sm:$0xff] %vm1786_vm2, %v1763_v20 }
 0x16a   : > { %1795 = vst.msk [vmem:[%s3333_s16 + $0x40] sm:$0xff] %vm1786_vm2, %v1762_v45 }
 0x16e   : > { %v2027_v59 = vpop.f32.mrb[8].mxu1 }
 0x16f   : > { %v1740_v8 = vmul.f32 %v2027_v59, %v3320_v5  ;;  %v1669_v19 = vpop.f32.mrb[9].mxu1 }
 0x170   : > { %v1739_v17 = vmul.f32 %v3320_v5, %v1669_v19 }
 0x171   : > { %v1779_v38 = vadd.f32 %v3327_v47, %v1740_v8 }
 0x172   : > { %v1778_v15 = vadd.f32 %v3327_v47, %v1739_v17 }
 0x173   : > { %1812 = vst.msk [vmem:[%s3333_s16 + $0xc8] sm:$0xff] %vm1786_vm2, %v1779_v38 }
 0x174   : > { %1811 = vst.msk [vmem:[%s3333_s16 + $0xc0] sm:$0xff] %vm1786_vm2, %v1778_v15 }
 0x178   : > { %v2006_v25 = vpop.f32.mrb[10].mxu0 }
 0x179   : > { %v1726_v7 = vmul.f32 %v2006_v25, %v3320_v5  ;;  %v1599_v44 = vpop.f32.mrb[11].mxu0 }
 0x17a   : > { %v1725_v11 = vmul.f32 %v3320_v5, %v1599_v44 }
 0x17b   : > { %v1765_v37 = vadd.f32 %v3327_v47, %v1726_v7 }
 0x17c   : > { %v1764_v60 = vadd.f32 %v3327_v47, %v1725_v11 }
 0x17d   : > { %1798 = vst.msk [vmem:[%s3333_s16 + $0x58] sm:$0xff] %vm1786_vm2, %v1765_v37 }
 0x17e   : > { %1797 = vst.msk [vmem:[%s3333_s16 + $0x50] sm:$0xff] %vm1786_vm2, %v1764_v60 }
 0x181   : > { %v2030_v46 = vpop.f32.mrb[10].mxu1 }
 0x182   : > { %v1742_v40 = vmul.f32 %v2030_v46, %v3320_v5  ;;  %v1679_v54 = vpop.f32.mrb[11].mxu1 }
 0x183   : > { %v1741_v48 = vmul.f32 %v3320_v5, %v1679_v54 }
 0x184   : > { %v1781_v27 = vadd.f32 %v3327_v47, %v1742_v40 }
 0x185   : > { %v1780_v30 = vadd.f32 %v3327_v47, %v1741_v48 }
 0x186   : > { %1814 = vst.msk [vmem:[%s3333_s16 + $0xd8] sm:$0xff] %vm1786_vm2, %v1781_v27 }
 0x187   : > { %1813 = vst.msk [vmem:[%s3333_s16 + $0xd0] sm:$0xff] %vm1786_vm2, %v1780_v30 }
 0x18c   : > { %v2009_v34 = vpop.f32.mrb[12].mxu0 }
 0x18d   : > { %v1728_v63 = vmul.f32 %v2009_v34, %v3320_v5  ;;  %v1609_v6 = vpop.f32.mrb[13].mxu0 }
 0x18e   : > { %v1727_v18 = vmul.f32 %v3320_v5, %v1609_v6 }
 0x18f   : > { %v1767_v39 = vadd.f32 %v3327_v47, %v1728_v63 }
 0x190   : > { %v1766_v56 = vadd.f32 %v3327_v47, %v1727_v18 }
 0x191   : > { %1800 = vst.msk [vmem:[%s3333_s16 + $0x68] sm:$0xff] %vm1786_vm2, %v1767_v39 }
 0x192   : > { %1799 = vst.msk [vmem:[%s3333_s16 + $0x60] sm:$0xff] %vm1786_vm2, %v1766_v56 }
 0x195   : > { %v2033_v57 = vpop.f32.mrb[12].mxu1 }
 0x196   : > { %v1744_v62 = vmul.f32 %v2033_v57, %v3320_v5  ;;  %v1689_v10 = vpop.f32.mrb[13].mxu1 }
 0x197   : > { %v1743_v4 = vmul.f32 %v3320_v5, %v1689_v10 }
 0x198   : > { %v1783_v42 = vadd.f32 %v3327_v47, %v1744_v62 }
 0x199   : > { %v1782_v32 = vadd.f32 %v3327_v47, %v1743_v4 }
 0x19a   : > { %1816 = vst.msk [vmem:[%s3333_s16 + $0xe8] sm:$0xff] %vm1786_vm2, %v1783_v42 }
 0x19b   : > { %1815 = vst.msk [vmem:[%s3333_s16 + $0xe0] sm:$0xff] %vm1786_vm2, %v1782_v32 }
 0x19e   : > { %v2012_v2 = vpop.f32.mrb[14].mxu0 }
 0x19f   : > { %v1730_v53 = vmul.f32 %v2012_v2, %v3320_v5  ;;  %v1619_v13 = vpop.f32.mrb[15].mxu0 }
 0x1a0   : > { %v1729_v24 = vmul.f32 %v3320_v5, %v1619_v13 }
 0x1a1   : > { %v1769_v61 = vadd.f32 %v3327_v47, %v1730_v53 }
 0x1a2   : > { %v1768_v41 = vadd.f32 %v3327_v47, %v1729_v24 }
 0x1a3   : > { %1802 = vst.msk [vmem:[%s3333_s16 + $0x78] sm:$0xff] %vm1786_vm2, %v1769_v61 }
 0x1a4   : > { %1801 = vst.msk [vmem:[%s3333_s16 + $0x70] sm:$0xff] %vm1786_vm2, %v1768_v41 }
 0x1a8   : > { %v2036_v50 = vpop.f32.mrb[14].mxu1 }
 0x1a9   : > { %v1746_v12 = vmul.f32 %v2036_v50, %v3320_v5  ;;  %v1699_v22 = vpop.f32.mrb[15].mxu1 }
 0x1aa   : > { %v1745_v1 = vmul.f32 %v3320_v5, %v1699_v22 }
 0x1ab   : > { %v1785_v16 = vadd.f32 %v3327_v47, %v1746_v12 }
 0x1ac   : > { %v1784_v14 = vadd.f32 %v3327_v47, %v1745_v1 }
 0x1ad   : > { %1818 = vst.msk [vmem:[%s3333_s16 + $0xf8] sm:$0xff] %vm1786_vm2, %v1785_v16 }
 0x1ae   : > { %1817 = vst.msk [vmem:[%s3333_s16 + $0xf0] sm:$0xff] %vm1786_vm2, %v1784_v14 }
 0x1af   : > { %2105 = shalt.err (!%p2102_p3)
}
 0x1b0   : > { %s2106_s29 = scalar_lea.hbm %s3459_s21, 4096  ;;  %s2110_s15 = scalar_lea.hbm %s3518_s7, 8192 }
 0x1b1   : > { %p2107_p4 = scmp.ne.s32.totalorder %s3459_s21, %s2106_s29  ;;  %p2111_p9 = scmp.lt.u32.totalorder %s3459_s21, %s3518_s7 }
 0x1b2   : > { %p2112_p10 = scmp.lt.u32.totalorder %s2110_s15, %s2106_s29  ;;  %p2114_p12 = scmp.lt.u32.totalorder %s2106_s29, %s3459_s21 }
 0x1b3   : > { %p2108_p7 = pnand %p2107_p4, %p2238_p5 }
 0x1b4   : > { %p2113_p11 = por %p2112_p10, %p2111_p9 }
 0x1b5   : > { %p2109_p8 = pneg %p2108_p7 }
 0x1b6   : > { %p2115_p13 = por %p2114_p12, %p2113_p11 }
 0x1b8   : > { %p2116_p0 = pnand %p2115_p13, %p2109_p8 }
 0x1ba   : > { %2119 = shalt.err (!%p2116_p0)
}
 0x1bb   : > { %s2158_s20 = smov 128   ;;  %s2159_s19 = smov 8  }
 0x1bc   : > { %2039 = dma.vmem_to_hbm [thread:$0]  (%p2238_p5), %s3461_s18, 4096, %s3459_s21, %s3470_s28, %s2158_s20, %s2158_s20, %s2159_s19  }
 0x1bd PF: > { %p2045_p1 = scmp.ge.s32.totalorder %s2154_s27, 2  ;;  %s1848_s22 = sand.u32 1, %s2142_s24  }
 0x1be   : > { %s1849_s23 = scalar_lea.sflag [#allocation4], %s1848_s22 }
 0x1bf   : > { %p2042_p2 = pnand %p2045_p1, %p2242_p6 }
 0x1c1   : > { %2137 = dma.done.wait (!%p2042_p2), %s1849_s23, 4096  }
 0x1c2   : > { %2139 = vsyncadd (!%p2042_p2), %s1849_s23, 4294963200  ;;  %p17_p3 = scmp.ge.s32.totalorder %s2225_s30, 4   ;;  %s3521_s24 = smov %s2146_s25 }
 0x1c3   : > { %s3522_s25 = smov %s2150_s26  ;;  %s3523_s26 = smov %s2236_s10 }
 0x1c4   : > { %s3524_s27 = smov %s2225_s30  ;;  %19 = sbr.rel (!%p17_p3) target bundleno = 3 (0x3), region = 85 }
 0x1cb   :  { %1854 = vsyncpa [#allocation4], 1 }
 0x1cc   :  { %1856 = vsyncpa [#allocation4 + $0x1], 1 }

</bundles_post_ra>
